<compile_context>
chip_gen: v6e
topology: v6e:2x2x1
jax: 0.10.0
libtpu: 0.0.40
codegen_flags: <defaults>
</compile_context>

<pallas_src>
import functools
import math

import jax
import jax.numpy as jnp
from jax import lax
from jax.experimental import pallas as pl
from jax.experimental.pallas import tpu as pltpu

# Small demo config implied by the module's __init__.
B = 2            # batch
S = 8            # sequence length (klen)
D = 32           # hidden_size
NH = 4           # num_attention_heads
DH = D // NH     # d_head
FF = 64          # intermediate size
NLAYERS = 2      # num_hidden_layers
MAX_KLEN = 16    # max_position_embeddings
LN_EPS = 1e-12

# Row layout of the packed "small vectors" buffer ([NLAYERS, 7, max(D, FF)]).
ROW_BO, ROW_B1, ROW_B2, ROW_LN1G, ROW_LN1B, ROW_LN2G, ROW_LN2B = range(7)
N_VEC_ROWS = 7


# ----------------------------- kernel helpers -------------------------------
def _layer_norm(x, g, b, eps):
    mu = jnp.mean(x, axis=-1, keepdims=True)
    var = jnp.mean((x - mu) ** 2, axis=-1, keepdims=True)
    return (x - mu) * jax.lax.rsqrt(var + eps) * g + b


def _rel_shift(x):
    """Vectorized Transformer-XL rel-shift of an [NH, S, S] score block.

    out[n,i,j] = x[n,i,S-1-i+j]  (j <= i)
               = 0               (j == i+1)
               = x[n,i+1,j-i-2]  (j >= i+2)   # 'wrapped' rows of the torch trick

    z = [x | 0 | x_next] followed by a row-dependent left shift by (S-1-i),
    done as a log2(S)-step barrel shifter of static lane rotations
    (slice+concat) gated by jnp.where masks.  pltpu.roll was considered but
    Mosaic's rotate needs (8,128)-aligned trailing dims (rows here are 2S+1=17
    lanes wide), so the proven slice+concat form is kept.
    """
    nh, s, _ = x.shape
    x_next = jnp.concatenate([x[:, 1:, :], jnp.zeros((nh, 1, s), x.dtype)], axis=1)
    z = jnp.concatenate([x, jnp.zeros((nh, s, 1), x.dtype), x_next], axis=-1)  # [NH,S,2S+1]
    w = 2 * s + 1
    row = jax.lax.broadcasted_iota(jnp.int32, (nh, s, w), 1)
    amt = (s - 1) - row                       # per-row left-shift amount (0..S-1)
    shift = 1
    while shift < s:                          # static unroll: log2(S) steps
        rolled = jnp.concatenate([z[:, :, shift:], z[:, :, :shift]], axis=-1)
        z = jnp.where((amt & shift) != 0, rolled, z)
        shift *= 2
    return z[:, :, :s]


# ------------------------------- Pallas kernel ------------------------------
def rel1_encoder_kernel(
    x_ref, mask_ref,
    wqkv_ref, wo_ref, w1_ref, w2_ref,
    remb_ref, rw_ref, rbias_ref, vec_ref,
    out_ref,
    *, n_layers, n_head, d_head, seq):
    """One grid step = one batch element; whole encoder (all layers) fused."""
    d = n_head * d_head
    ff_dim = w1_ref.shape[-1]
    scale = 1.0 / math.sqrt(d_head)
    bf16 = jnp.bfloat16
    f32 = jnp.float32

    dn_nn = (((2,), (1,)), ((0,), (0,)))      # batched matmul, contract (lhs[-1], rhs[1])
    dn_nt = (((2,), (2,)), ((0,), (0,)))      # batched matmul, contract last dims of both

    x = x_ref[0].astype(f32)                  # [S, D]   residual stream (f32)
    mask = mask_ref[0]                        # [1, S]   additive key mask

    for l in range(n_layers):                 # static unroll over layers
        vec = vec_ref[l]                      # [7, VEC_W] packed small params
        bo  = vec[ROW_BO:ROW_BO + 1, 0:d]
        b1  = vec[ROW_B1:ROW_B1 + 1, 0:ff_dim]
        b2  = vec[ROW_B2:ROW_B2 + 1, 0:d]
        g1  = vec[ROW_LN1G:ROW_LN1G + 1, 0:d]
        be1 = vec[ROW_LN1B:ROW_LN1B + 1, 0:d]
        g2  = vec[ROW_LN2G:ROW_LN2G + 1, 0:d]
        be2 = vec[ROW_LN2B:ROW_LN2B + 1, 0:d]

        # ---- per-head Q/K/V projections (bf16 MXU, f32 accumulate) ----
        # Heads live in a leading batch dim from the start: no lane slicing.
        x_h = jnp.broadcast_to(x.astype(bf16)[None], (n_head, seq, d))    # [NH,S,D]
        q_h = lax.dot_general(x_h, wqkv_ref[0 * n_layers + l], dn_nn,
                              preferred_element_type=f32)                 # [NH,S,DH]
        k_h = lax.dot_general(x_h, wqkv_ref[1 * n_layers + l], dn_nn,
                              preferred_element_type=f32)                 # [NH,S,DH]
        v_h = lax.dot_general(x_h, wqkv_ref[2 * n_layers + l], dn_nn,
                              preferred_element_type=f32)                 # [NH,S,DH]
        # bq is folded into rw_ref / rbias_ref, bk cancels in softmax, and
        # bv / head_mask are folded into W_O / b_o host-side (all exact).

        # ---- relative-attention scores ----
        q_c = (q_h + rw_ref[l]).astype(bf16)                              # q + r_w_bias(+bq)
        ac = lax.dot_general(q_c, k_h.astype(bf16), dn_nt,
                             preferred_element_type=f32)                  # [NH,S,S]
        pos = lax.dot_general(q_h.astype(bf16), remb_ref[l], dn_nt,
                              preferred_element_type=f32)                 # [NH,S,S]
        bd = _rel_shift(pos + rbias_ref[l])                               # [NH,S,S]
        scores = (ac + bd) * scale + mask                                 # additive key mask

        # stable softmax over keys (f32; reciprocal on the EUP)
        m = jnp.max(scores, axis=-1, keepdims=True)
        e = jnp.exp(scores - m)
        p = e * pl.reciprocal(jnp.sum(e, axis=-1, keepdims=True), approx=True)

        # ---- weighted values + per-head output projection (no head concat) ----
        ctx = lax.dot_general(p.astype(bf16), v_h.astype(bf16), dn_nn,
                              preferred_element_type=f32)                 # [NH,S,DH]
        per_head = lax.dot_general(ctx.astype(bf16), wo_ref[l], dn_nn,
                                   preferred_element_type=f32)            # [NH,S,D]
        attn_out = jnp.sum(per_head, axis=0) + bo                         # [S,D]

        h1 = _layer_norm(attn_out + x, g1, be1, LN_EPS)

        # ---- FFN ----
        ffv = jnp.dot(h1.astype(bf16), w1_ref[l],
                      preferred_element_type=f32) + b1
        ffv = jax.nn.gelu(ffv, approximate=True)
        ffv = jnp.dot(ffv.astype(bf16), w2_ref[l],
                      preferred_element_type=f32) + b2
        x = _layer_norm(ffv + h1, g2, be2, LN_EPS)

    out_ref[0] = x.astype(out_ref.dtype)


# ------------------------------ host wrappers --------------------------------
def _pack_params(params, head_mask, klen):
    """Pack / fold parameters host-side (f32 math, exact) and cast MXU weights
    to bf16.  Folds (all mathematically exact):
      * head_mask -> per-head W_O scale (post-softmax per-head constant)
      * bq        -> r_w_bias' (content path) and r_bias' (position path)
      * bk        -> dropped: per-(head,row) constant over all keys, cancels
                     in the softmax
      * bv        -> b_o' via sum_j softmax_ij == 1
    """
    layers = params["layers"]
    n_layers = len(layers)

    def stack(key):
        return jnp.stack([lp[key] for lp in layers], axis=0)

    def split_in(w):   # [L, D, D(out)] -> [L, NH, D, DH] (per-head output cols)
        return jnp.transpose(w.reshape(n_layers, D, NH, DH), (0, 2, 1, 3))

    wq_h, wk_h, wv_h = split_in(stack("wq")), split_in(stack("wk")), split_in(stack("wv"))
    wqkv = jnp.stack([wq_h, wk_h, wv_h], axis=0).reshape(3 * n_layers, NH, D, DH)

    wo_h = stack("wo").reshape(n_layers, NH, DH, D) * head_mask[:, :, None, None]

    bq_h = stack("bq").reshape(n_layers, 1, NH, DH).transpose(0, 2, 1, 3)   # [L,NH,1,DH]
    bv_h = stack("bv").reshape(n_layers, 1, NH, DH).transpose(0, 2, 1, 3)   # [L,NH,1,DH]

    remb = jnp.transpose(params["r_emb"][:, :klen], (0, 2, 1, 3))           # [L,NH,S,DH]
    rw = params["r_w_bias"][:, :, None, :] + bq_h                           # [L,NH,1,DH]
    rbias = (jnp.transpose(params["r_bias"][:, :klen], (0, 2, 1))[:, :, None, :]
             + jnp.einsum("lnkd,lnsd->lnks", bq_h, remb))                   # [L,NH,1,S]
    bo = stack("bo") + jnp.einsum("lnkd,lndo->lko", bv_h, wo_h)             # [L,1,D]

    vec_w = max(D, FF)

    def pad_lane(v):                                   # [L,1,W] -> [L,1,vec_w]
        return jnp.pad(v, ((0, 0), (0, 0), (0, vec_w - v.shape[-1])))

    vec = jnp.concatenate(
        [pad_lane(bo), pad_lane(stack("b1")), pad_lane(stack("b2")),
         pad_lane(stack("ln1g")), pad_lane(stack("ln1b")),
         pad_lane(stack("ln2g")), pad_lane(stack("ln2b"))], axis=1)         # [L,7,vec_w]

    return dict(
        wqkv=wqkv.astype(jnp.bfloat16),
        wo=wo_h.astype(jnp.bfloat16),
        w1=stack("w1").astype(jnp.bfloat16),
        w2=stack("w2").astype(jnp.bfloat16),
        remb=remb.astype(jnp.bfloat16),
        rw=rw.astype(jnp.float32),
        rbias=rbias.astype(jnp.float32),
        vec=vec.astype(jnp.float32))


def rel1_encoder_forward(hidden_states, params, attention_mask, head_mask):
    bsz, klen, d = hidden_states.shape
    packed = _pack_params(params, head_mask, klen)

    kernel = functools.partial(rel1_encoder_kernel, n_layers=NLAYERS, n_head=NH,
                               d_head=DH, seq=klen)

    def full(arr):
        shape = arr.shape
        return pl.BlockSpec(shape, lambda b, _s=shape: (0,) * len(_s))

    out = pl.pallas_call(
        kernel,
        out_shape=jax.ShapeDtypeStruct((bsz, klen, d), jnp.float32),
        grid=(bsz,),
        in_specs=[
            pl.BlockSpec((1, klen, d), lambda b: (b, 0, 0)),      # hidden_states
            pl.BlockSpec((1, 1, klen), lambda b: (b, 0, 0)),      # additive mask
            full(packed["wqkv"]),
            full(packed["wo"]),
            full(packed["w1"]),
            full(packed["w2"]),
            full(packed["remb"]),
            full(packed["rw"]),
            full(packed["rbias"]),
            full(packed["vec"]),
        ],
        out_specs=pl.BlockSpec((1, klen, d), lambda b: (b, 0, 0)),
        compiler_params=pltpu.CompilerParams(
            dimension_semantics=("parallel",)),                   # v7x: one batch per TC
    )(hidden_states, attention_mask,
      packed["wqkv"], packed["wo"], packed["w1"], packed["w2"],
      packed["remb"], packed["rw"], packed["rbias"], packed["vec"])
    return (out,)


# --------------------------- deterministic params ----------------------------
def init_params(key):
    def nrm(k, shape, scale=0.02):
        return scale * jax.random.normal(k, shape, jnp.float32)

    keys = iter(jax.random.split(key, 64))
    layers = []
    for _ in range(NLAYERS):
        layers.append(dict(
            wq=nrm(next(keys), (D, D)), bq=jnp.zeros((1, D), jnp.float32),
            wk=nrm(next(keys), (D, D)), bk=jnp.zeros((1, D), jnp.float32),
            wv=nrm(next(keys), (D, D)), bv=jnp.zeros((1, D), jnp.float32),
            wo=nrm(next(keys), (D, D)), bo=jnp.zeros((1, D), jnp.float32),
            ln1g=jnp.ones((1, D), jnp.float32), ln1b=jnp.zeros((1, D), jnp.float32),
            w1=nrm(next(keys), (D, FF)), b1=jnp.zeros((1, FF), jnp.float32),
            w2=nrm(next(keys), (FF, D)), b2=jnp.zeros((1, D), jnp.float32),
            ln2g=jnp.ones((1, D), jnp.float32), ln2b=jnp.zeros((1, D), jnp.float32),
        ))
    return dict(
        layers=layers,
        r_emb=nrm(next(keys), (NLAYERS, MAX_KLEN, NH, DH)),
        r_w_bias=nrm(next(keys), (NLAYERS, NH, DH)),
        r_bias=nrm(next(keys), (NLAYERS, MAX_KLEN, NH)),
    )


# ------------------------------ pure-JAX reference ---------------------------
def _rel_shift_ref(x):                    # x: [..., Q, K]  (torch pad/view trick)
    q, k = x.shape[-2], x.shape[-1]
    pad = jnp.pad(x, [(0, 0)] * (x.ndim - 2) + [(0, 0), (1, 0)])
    pad = pad.reshape(x.shape[:-2] + (k + 1, q))
    return pad[..., 1:, :].reshape(x.shape)


def reference_forward(x, params, attention_mask, head_mask):
    h = x
    klen = h.shape[1]
    for i in range(NLAYERS):
        lp = params["layers"][i]
        remb = params["r_emb"][i, :klen]        # [S, NH, DH]
        rwb = params["r_w_bias"][i]             # [NH, DH]
        rbias = params["r_bias"][i, :klen]      # [S, NH]
        q = (h @ lp["wq"] + lp["bq"]).reshape(B, klen, NH, DH)
        k = (h @ lp["wk"] + lp["bk"]).reshape(B, klen, NH, DH)
        v = (h @ lp["wv"] + lp["bv"]).reshape(B, klen, NH, DH)
        ac = jnp.einsum("bind,bjnd->bnij", q + rwb[None, None], k)
        b_ = jnp.einsum("bind,jnd->bnij", q, remb)
        d_ = rbias.T[None, :, None, :]                        # [1, NH, 1, S]
        bd = _rel_shift_ref(b_ + d_)
        scores = (ac + bd) / math.sqrt(DH) + attention_mask[:, None, :, :]
        p = jax.nn.softmax(scores, axis=-1)
        p = p * head_mask[i][None, :, None, None]
        ctx = jnp.einsum("bnij,bjnd->bind", p, v).reshape(B, klen, D)
        h1 = _layer_norm(ctx @ lp["wo"] + lp["bo"] + h, lp["ln1g"], lp["ln1b"], LN_EPS)
        ff = jax.nn.gelu(h1 @ lp["w1"] + lp["b1"], approximate=True) @ lp["w2"] + lp["b2"]
        h = _layer_norm(ff + h1, lp["ln2g"], lp["ln2b"], LN_EPS)
    return h


# ------------------------------------ main ------------------------------------
if __name__ == "__main__":
    root = jax.random.PRNGKey(0)
    k_x, k_p = jax.random.split(root)
    hidden_states = jax.random.normal(k_x, (B, S, D), jnp.float32)
    attention_mask = jnp.zeros((B, 1, S), jnp.float32)   # additive mask (0 = attend)
    head_mask = jnp.ones((NLAYERS, NH), jnp.float32)
    params = init_params(k_p)

    (out,) = rel1_encoder_forward(hidden_states, params, attention_mask, head_mask)
    out = jax.block_until_ready(out)

    ref = jax.block_until_ready(
        reference_forward(hidden_states, params, attention_mask, head_mask))

    assert out.shape == (B, S, D)
    assert bool(jnp.all(jnp.isfinite(out)))
    # Kernel uses bf16 MXU operands (per perf review) with f32 accumulation;
    # the reference is pure f32, so the tolerance reflects bf16 rounding.
    assert bool(jnp.allclose(out, ref, atol=2e-2, rtol=2e-2)), "mismatch vs reference"
    print("KERNEL_OK")
</pallas_src>

<mosaic_0001>
module attributes {stable_mosaic.version = 11 : i64} {
  func.func @rel1_encoder_kernel(%arg0: i32, %arg1: memref<1x8x32xf32, #tpu.memory_space<vmem>>, %arg2: memref<1x1x8xf32, #tpu.memory_space<vmem>>, %arg3: memref<6x4x32x8xbf16, #tpu.memory_space<vmem>>, %arg4: memref<2x4x8x32xbf16, #tpu.memory_space<vmem>>, %arg5: memref<2x32x64xbf16, #tpu.memory_space<vmem>>, %arg6: memref<2x64x32xbf16, #tpu.memory_space<vmem>>, %arg7: memref<2x4x8x8xbf16, #tpu.memory_space<vmem>>, %arg8: memref<2x4x1x8xf32, #tpu.memory_space<vmem>>, %arg9: memref<2x4x1x8xf32, #tpu.memory_space<vmem>>, %arg10: memref<2x7x64xf32, #tpu.memory_space<vmem>>, %arg11: memref<1x8x32xf32, #tpu.memory_space<vmem>>) attributes {dimension_semantics = [#tpu.dimension_semantics<parallel>], iteration_bounds = array<i64: 2>, scalar_prefetch = 0 : i64, scratch_operands = 0 : i64, tpu.core_type = #tpu.core_type<tc>, window_params = [{transform_indices = @transform_0, window_bounds = array<i64: 1, 8, 32>}, {transform_indices = @transform_1, window_bounds = array<i64: 1, 1, 8>}, {pipeline_mode = #tpu.pipeline_mode<synchronous>, transform_indices = @transform_2, window_bounds = array<i64: 6, 4, 32, 8>}, {pipeline_mode = #tpu.pipeline_mode<synchronous>, transform_indices = @transform_3, window_bounds = array<i64: 2, 4, 8, 32>}, {pipeline_mode = #tpu.pipeline_mode<synchronous>, transform_indices = @transform_4, window_bounds = array<i64: 2, 32, 64>}, {pipeline_mode = #tpu.pipeline_mode<synchronous>, transform_indices = @transform_5, window_bounds = array<i64: 2, 64, 32>}, {pipeline_mode = #tpu.pipeline_mode<synchronous>, transform_indices = @transform_6, window_bounds = array<i64: 2, 4, 8, 8>}, {pipeline_mode = #tpu.pipeline_mode<synchronous>, transform_indices = @transform_7, window_bounds = array<i64: 2, 4, 1, 8>}, {pipeline_mode = #tpu.pipeline_mode<synchronous>, transform_indices = @transform_8, window_bounds = array<i64: 2, 4, 1, 8>}, {pipeline_mode = #tpu.pipeline_mode<synchronous>, transform_indices = @transform_9, window_bounds = array<i64: 2, 7, 64>}, {transform_indices = @transform_10, window_bounds = array<i64: 1, 8, 32>}]} {
    %c0 = arith.constant 0 : index
    %c0_0 = arith.constant 0 : index
    %c0_1 = arith.constant 0 : index
    %0 = vector.load %arg1[%c0, %c0_0, %c0_1] : memref<1x8x32xf32, #tpu.memory_space<vmem>>, vector<1x8x32xf32>
    %1 = vector.shape_cast %0 : vector<1x8x32xf32> to vector<8x32xf32>
    %c0_2 = arith.constant 0 : index
    %c0_3 = arith.constant 0 : index
    %c0_4 = arith.constant 0 : index
    %2 = vector.load %arg2[%c0_2, %c0_3, %c0_4] : memref<1x1x8xf32, #tpu.memory_space<vmem>>, vector<1x1x8xf32>
    %3 = vector.shape_cast %2 : vector<1x1x8xf32> to vector<1x8xf32>
    %c0_5 = arith.constant 0 : index
    %c0_6 = arith.constant 0 : index
    %c0_7 = arith.constant 0 : index
    %4 = vector.load %arg10[%c0_5, %c0_6, %c0_7] : memref<2x7x64xf32, #tpu.memory_space<vmem>>, vector<1x7x64xf32>
    %5 = vector.shape_cast %4 : vector<1x7x64xf32> to vector<7x64xf32>
    %6 = vector.extract_strided_slice %5 {offsets = [0, 0], sizes = [1, 32], strides = [1, 1]} : vector<7x64xf32> to vector<1x32xf32>
    %7 = vector.extract_strided_slice %5 {offsets = [1, 0], sizes = [1, 64], strides = [1, 1]} : vector<7x64xf32> to vector<1x64xf32>
    %8 = vector.extract_strided_slice %5 {offsets = [2, 0], sizes = [1, 32], strides = [1, 1]} : vector<7x64xf32> to vector<1x32xf32>
    %9 = vector.extract_strided_slice %5 {offsets = [3, 0], sizes = [1, 32], strides = [1, 1]} : vector<7x64xf32> to vector<1x32xf32>
    %10 = vector.extract_strided_slice %5 {offsets = [4, 0], sizes = [1, 32], strides = [1, 1]} : vector<7x64xf32> to vector<1x32xf32>
    %11 = vector.extract_strided_slice %5 {offsets = [5, 0], sizes = [1, 32], strides = [1, 1]} : vector<7x64xf32> to vector<1x32xf32>
    %12 = vector.extract_strided_slice %5 {offsets = [6, 0], sizes = [1, 32], strides = [1, 1]} : vector<7x64xf32> to vector<1x32xf32>
    %13 = arith.truncf %1 : vector<8x32xf32> to vector<8x32xbf16>
    %14 = vector.shape_cast %13 : vector<8x32xbf16> to vector<1x8x32xbf16>
    %15 = vector.shape_cast %14 : vector<1x8x32xbf16> to vector<1x8x32xbf16>
    %16 = vector.broadcast %15 : vector<1x8x32xbf16> to vector<4x8x32xbf16>
    %c0_8 = arith.constant 0 : index
    %c0_9 = arith.constant 0 : index
    %c0_10 = arith.constant 0 : index
    %c0_11 = arith.constant 0 : index
    %17 = vector.load %arg3[%c0_8, %c0_9, %c0_10, %c0_11] : memref<6x4x32x8xbf16, #tpu.memory_space<vmem>>, vector<1x4x32x8xbf16>
    %18 = vector.shape_cast %17 : vector<1x4x32x8xbf16> to vector<4x32x8xbf16>
    %cst = arith.constant dense<0.000000e+00> : vector<4x8x8xf32>
    %19 = tpu.matmul %16, %18, %cst {dimension_numbers = #tpu.dot_dimension_numbers<[2], [1], [1], [2], [0, 0, 0, 1, 1, 2], [0], [0]>} : vector<4x8x32xbf16>, vector<4x32x8xbf16>, vector<4x8x8xf32> -> vector<4x8x8xf32>
    %c2 = arith.constant 2 : index
    %c0_12 = arith.constant 0 : index
    %c0_13 = arith.constant 0 : index
    %c0_14 = arith.constant 0 : index
    %20 = vector.load %arg3[%c2, %c0_12, %c0_13, %c0_14] : memref<6x4x32x8xbf16, #tpu.memory_space<vmem>>, vector<1x4x32x8xbf16>
    %21 = vector.shape_cast %20 : vector<1x4x32x8xbf16> to vector<4x32x8xbf16>
    %cst_15 = arith.constant dense<0.000000e+00> : vector<4x8x8xf32>
    %22 = tpu.matmul %16, %21, %cst_15 {dimension_numbers = #tpu.dot_dimension_numbers<[2], [1], [1], [2], [0, 0, 0, 1, 1, 2], [0], [0]>} : vector<4x8x32xbf16>, vector<4x32x8xbf16>, vector<4x8x8xf32> -> vector<4x8x8xf32>
    %c4 = arith.constant 4 : index
    %c0_16 = arith.constant 0 : index
    %c0_17 = arith.constant 0 : index
    %c0_18 = arith.constant 0 : index
    %23 = vector.load %arg3[%c4, %c0_16, %c0_17, %c0_18] : memref<6x4x32x8xbf16, #tpu.memory_space<vmem>>, vector<1x4x32x8xbf16>
    %24 = vector.shape_cast %23 : vector<1x4x32x8xbf16> to vector<4x32x8xbf16>
    %cst_19 = arith.constant dense<0.000000e+00> : vector<4x8x8xf32>
    %25 = tpu.matmul %16, %24, %cst_19 {dimension_numbers = #tpu.dot_dimension_numbers<[2], [1], [1], [2], [0, 0, 0, 1, 1, 2], [0], [0]>} : vector<4x8x32xbf16>, vector<4x32x8xbf16>, vector<4x8x8xf32> -> vector<4x8x8xf32>
    %c0_20 = arith.constant 0 : index
    %c0_21 = arith.constant 0 : index
    %c0_22 = arith.constant 0 : index
    %c0_23 = arith.constant 0 : index
    %26 = vector.load %arg8[%c0_20, %c0_21, %c0_22, %c0_23] : memref<2x4x1x8xf32, #tpu.memory_space<vmem>>, vector<1x4x1x8xf32>
    %27 = vector.shape_cast %26 : vector<1x4x1x8xf32> to vector<4x1x8xf32>
    %28 = vector.broadcast %27 : vector<4x1x8xf32> to vector<4x8x8xf32>
    %29 = arith.addf %19, %28 : vector<4x8x8xf32>
    %30 = arith.truncf %29 : vector<4x8x8xf32> to vector<4x8x8xbf16>
    %31 = arith.truncf %22 : vector<4x8x8xf32> to vector<4x8x8xbf16>
    %cst_24 = arith.constant dense<0.000000e+00> : vector<4x8x8xf32>
    %32 = tpu.matmul %30, %31, %cst_24 {dimension_numbers = #tpu.dot_dimension_numbers<[2], [2], [1], [1], [0, 0, 0, 1, 1, 1], [0], [0]>} : vector<4x8x8xbf16>, vector<4x8x8xbf16>, vector<4x8x8xf32> -> vector<4x8x8xf32>
    %33 = arith.truncf %19 : vector<4x8x8xf32> to vector<4x8x8xbf16>
    %c0_25 = arith.constant 0 : index
    %c0_26 = arith.constant 0 : index
    %c0_27 = arith.constant 0 : index
    %c0_28 = arith.constant 0 : index
    %34 = vector.load %arg7[%c0_25, %c0_26, %c0_27, %c0_28] : memref<2x4x8x8xbf16, #tpu.memory_space<vmem>>, vector<1x4x8x8xbf16>
    %35 = vector.shape_cast %34 : vector<1x4x8x8xbf16> to vector<4x8x8xbf16>
    %cst_29 = arith.constant dense<0.000000e+00> : vector<4x8x8xf32>
    %36 = tpu.matmul %33, %35, %cst_29 {dimension_numbers = #tpu.dot_dimension_numbers<[2], [2], [1], [1], [0, 0, 0, 1, 1, 1], [0], [0]>} : vector<4x8x8xbf16>, vector<4x8x8xbf16>, vector<4x8x8xf32> -> vector<4x8x8xf32>
    %c0_30 = arith.constant 0 : index
    %c0_31 = arith.constant 0 : index
    %c0_32 = arith.constant 0 : index
    %c0_33 = arith.constant 0 : index
    %37 = vector.load %arg9[%c0_30, %c0_31, %c0_32, %c0_33] : memref<2x4x1x8xf32, #tpu.memory_space<vmem>>, vector<1x4x1x8xf32>
    %38 = vector.shape_cast %37 : vector<1x4x1x8xf32> to vector<4x1x8xf32>
    %39 = vector.broadcast %38 : vector<4x1x8xf32> to vector<4x8x8xf32>
    %40 = arith.addf %36, %39 : vector<4x8x8xf32>
    %41 = vector.extract_strided_slice %40 {offsets = [0, 1, 0], sizes = [4, 7, 8], strides = [1, 1, 1]} : vector<4x8x8xf32> to vector<4x7x8xf32>
    %cst_34 = arith.constant 0.000000e+00 : f32
    %42 = vector.broadcast %cst_34 : f32 to vector<4x1x8xf32>
    %43 = tpu.concatenate %41, %42 in 1 : vector<4x7x8xf32>, vector<4x1x8xf32> -> vector<4x8x8xf32>
    %cst_35 = arith.constant 0.000000e+00 : f32
    %44 = vector.broadcast %cst_35 : f32 to vector<4x8x1xf32>
    %45 = tpu.concatenate %40, %44, %43 in 2 : vector<4x8x8xf32>, vector<4x8x1xf32>, vector<4x8x8xf32> -> vector<4x8x17xf32>
    %46 = tpu.iota {dimensions = array<i32: 1>} : vector<4x8x17xi32>
    %c7_i32 = arith.constant 7 : i32
    %47 = vector.broadcast %c7_i32 : i32 to vector<4x8x17xi32>
    %48 = arith.subi %47, %46 : vector<4x8x17xi32>
    %49 = vector.extract_strided_slice %45 {offsets = [0, 0, 1], sizes = [4, 8, 16], strides = [1, 1, 1]} : vector<4x8x17xf32> to vector<4x8x16xf32>
    %50 = vector.extract_strided_slice %45 {offsets = [0, 0, 0], sizes = [4, 8, 1], strides = [1, 1, 1]} : vector<4x8x17xf32> to vector<4x8x1xf32>
    %51 = tpu.concatenate %49, %50 in 2 : vector<4x8x16xf32>, vector<4x8x1xf32> -> vector<4x8x17xf32>
    %c1_i32 = arith.constant 1 : i32
    %52 = vector.broadcast %c1_i32 : i32 to vector<4x8x17xi32>
    %53 = arith.andi %48, %52 : vector<4x8x17xi32>
    %c0_i32 = arith.constant 0 : i32
    %54 = vector.broadcast %c0_i32 : i32 to vector<4x8x17xi32>
    %55 = arith.cmpi ne, %53, %54 : vector<4x8x17xi32>
    %56 = arith.select %55, %51, %45 : vector<4x8x17xi1>, vector<4x8x17xf32>
    %57 = vector.extract_strided_slice %56 {offsets = [0, 0, 2], sizes = [4, 8, 15], strides = [1, 1, 1]} : vector<4x8x17xf32> to vector<4x8x15xf32>
    %58 = vector.extract_strided_slice %56 {offsets = [0, 0, 0], sizes = [4, 8, 2], strides = [1, 1, 1]} : vector<4x8x17xf32> to vector<4x8x2xf32>
    %59 = tpu.concatenate %57, %58 in 2 : vector<4x8x15xf32>, vector<4x8x2xf32> -> vector<4x8x17xf32>
    %c2_i32 = arith.constant 2 : i32
    %60 = vector.broadcast %c2_i32 : i32 to vector<4x8x17xi32>
    %61 = arith.andi %48, %60 : vector<4x8x17xi32>
    %c0_i32_36 = arith.constant 0 : i32
    %62 = vector.broadcast %c0_i32_36 : i32 to vector<4x8x17xi32>
    %63 = arith.cmpi ne, %61, %62 : vector<4x8x17xi32>
    %64 = arith.select %63, %59, %56 : vector<4x8x17xi1>, vector<4x8x17xf32>
    %65 = vector.extract_strided_slice %64 {offsets = [0, 0, 4], sizes = [4, 8, 13], strides = [1, 1, 1]} : vector<4x8x17xf32> to vector<4x8x13xf32>
    %66 = vector.extract_strided_slice %64 {offsets = [0, 0, 0], sizes = [4, 8, 4], strides = [1, 1, 1]} : vector<4x8x17xf32> to vector<4x8x4xf32>
    %67 = tpu.concatenate %65, %66 in 2 : vector<4x8x13xf32>, vector<4x8x4xf32> -> vector<4x8x17xf32>
    %c4_i32 = arith.constant 4 : i32
    %68 = vector.broadcast %c4_i32 : i32 to vector<4x8x17xi32>
    %69 = arith.andi %48, %68 : vector<4x8x17xi32>
    %c0_i32_37 = arith.constant 0 : i32
    %70 = vector.broadcast %c0_i32_37 : i32 to vector<4x8x17xi32>
    %71 = arith.cmpi ne, %69, %70 : vector<4x8x17xi32>
    %72 = arith.select %71, %67, %64 : vector<4x8x17xi1>, vector<4x8x17xf32>
    %73 = vector.extract_strided_slice %72 {offsets = [0, 0, 0], sizes = [4, 8, 8], strides = [1, 1, 1]} : vector<4x8x17xf32> to vector<4x8x8xf32>
    %74 = arith.addf %32, %73 : vector<4x8x8xf32>
    %cst_38 = arith.constant 0.353553385 : f32
    %75 = vector.broadcast %cst_38 : f32 to vector<4x8x8xf32>
    %76 = arith.mulf %74, %75 : vector<4x8x8xf32>
    %77 = vector.shape_cast %3 : vector<1x8xf32> to vector<1x1x8xf32>
    %78 = vector.broadcast %77 : vector<1x1x8xf32> to vector<4x8x8xf32>
    %79 = arith.addf %76, %78 : vector<4x8x8xf32>
    %cst_39 = arith.constant dense<0xFF800000> : vector<4x8xf32>
    %80 = vector.multi_reduction <maximumf>, %79, %cst_39 [2] : vector<4x8x8xf32> to vector<4x8xf32>
    %81 = vector.shape_cast %80 : vector<4x8xf32> to vector<4x8x1xf32>
    %82 = vector.broadcast %81 : vector<4x8x1xf32> to vector<4x8x8xf32>
    %83 = arith.subf %79, %82 : vector<4x8x8xf32>
    %84 = math.exp %83 : vector<4x8x8xf32>
    %cst_40 = arith.constant dense<0.000000e+00> : vector<4x8xf32>
    %85 = vector.multi_reduction <add>, %84, %cst_40 [2] : vector<4x8x8xf32> to vector<4x8xf32>
    %86 = vector.shape_cast %85 : vector<4x8xf32> to vector<4x8x1xf32>
    %87 = tpu.reciprocal %86 {approx = true} : vector<4x8x1xf32> -> vector<4x8x1xf32>
    %88 = vector.broadcast %87 : vector<4x8x1xf32> to vector<4x8x8xf32>
    %89 = arith.mulf %84, %88 : vector<4x8x8xf32>
    %90 = arith.truncf %89 : vector<4x8x8xf32> to vector<4x8x8xbf16>
    %91 = arith.truncf %25 : vector<4x8x8xf32> to vector<4x8x8xbf16>
    %cst_41 = arith.constant dense<0.000000e+00> : vector<4x8x8xf32>
    %92 = tpu.matmul %90, %91, %cst_41 {dimension_numbers = #tpu.dot_dimension_numbers<[2], [1], [1], [2], [0, 0, 0, 1, 1, 2], [0], [0]>} : vector<4x8x8xbf16>, vector<4x8x8xbf16>, vector<4x8x8xf32> -> vector<4x8x8xf32>
    %93 = arith.truncf %92 : vector<4x8x8xf32> to vector<4x8x8xbf16>
    %c0_42 = arith.constant 0 : index
    %c0_43 = arith.constant 0 : index
    %c0_44 = arith.constant 0 : index
    %c0_45 = arith.constant 0 : index
    %94 = vector.load %arg4[%c0_42, %c0_43, %c0_44, %c0_45] : memref<2x4x8x32xbf16, #tpu.memory_space<vmem>>, vector<1x4x8x32xbf16>
    %95 = vector.shape_cast %94 : vector<1x4x8x32xbf16> to vector<4x8x32xbf16>
    %cst_46 = arith.constant dense<0.000000e+00> : vector<4x8x32xf32>
    %96 = tpu.matmul %93, %95, %cst_46 {dimension_numbers = #tpu.dot_dimension_numbers<[2], [1], [1], [2], [0, 0, 0, 1, 1, 2], [0], [0]>} : vector<4x8x8xbf16>, vector<4x8x32xbf16>, vector<4x8x32xf32> -> vector<4x8x32xf32>
    %cst_47 = arith.constant dense<0.000000e+00> : vector<8x32xf32>
    %97 = vector.multi_reduction <add>, %96, %cst_47 [0] : vector<4x8x32xf32> to vector<8x32xf32>
    %98 = vector.broadcast %6 : vector<1x32xf32> to vector<8x32xf32>
    %99 = arith.addf %97, %98 : vector<8x32xf32>
    %100 = arith.addf %99, %1 : vector<8x32xf32>
    %cst_48 = arith.constant dense<0.000000e+00> : vector<8xf32>
    %101 = vector.multi_reduction <add>, %100, %cst_48 [1] : vector<8x32xf32> to vector<8xf32>
    %102 = vector.shape_cast %101 : vector<8xf32> to vector<8x1xf32>
    %cst_49 = arith.constant 3.200000e+01 : f32
    %103 = vector.broadcast %cst_49 : f32 to vector<8x1xf32>
    %104 = arith.divf %102, %103 : vector<8x1xf32>
    %105 = vector.broadcast %104 : vector<8x1xf32> to vector<8x32xf32>
    %106 = arith.subf %100, %105 : vector<8x32xf32>
    %107 = arith.mulf %106, %106 : vector<8x32xf32>
    %cst_50 = arith.constant dense<0.000000e+00> : vector<8xf32>
    %108 = vector.multi_reduction <add>, %107, %cst_50 [1] : vector<8x32xf32> to vector<8xf32>
    %109 = vector.shape_cast %108 : vector<8xf32> to vector<8x1xf32>
    %cst_51 = arith.constant 3.200000e+01 : f32
    %110 = vector.broadcast %cst_51 : f32 to vector<8x1xf32>
    %111 = arith.divf %109, %110 : vector<8x1xf32>
    %112 = vector.broadcast %104 : vector<8x1xf32> to vector<8x32xf32>
    %113 = arith.subf %100, %112 : vector<8x32xf32>
    %cst_52 = arith.constant 9.99999996E-13 : f32
    %114 = vector.broadcast %cst_52 : f32 to vector<8x1xf32>
    %115 = arith.addf %111, %114 : vector<8x1xf32>
    %116 = math.rsqrt %115 : vector<8x1xf32>
    %117 = vector.broadcast %116 : vector<8x1xf32> to vector<8x32xf32>
    %118 = arith.mulf %113, %117 : vector<8x32xf32>
    %119 = vector.broadcast %9 : vector<1x32xf32> to vector<8x32xf32>
    %120 = arith.mulf %118, %119 : vector<8x32xf32>
    %121 = vector.broadcast %10 : vector<1x32xf32> to vector<8x32xf32>
    %122 = arith.addf %120, %121 : vector<8x32xf32>
    %123 = arith.truncf %122 : vector<8x32xf32> to vector<8x32xbf16>
    %c0_53 = arith.constant 0 : index
    %c0_54 = arith.constant 0 : index
    %c0_55 = arith.constant 0 : index
    %124 = vector.load %arg5[%c0_53, %c0_54, %c0_55] : memref<2x32x64xbf16, #tpu.memory_space<vmem>>, vector<1x32x64xbf16>
    %125 = vector.shape_cast %124 : vector<1x32x64xbf16> to vector<32x64xbf16>
    %cst_56 = arith.constant dense<0.000000e+00> : vector<8x64xf32>
    %126 = tpu.matmul %123, %125, %cst_56 {dimension_numbers = #tpu.dot_dimension_numbers<[1], [0], [0], [1], [0, 0, 1, 1], [], []>} : vector<8x32xbf16>, vector<32x64xbf16>, vector<8x64xf32> -> vector<8x64xf32>
    %127 = vector.broadcast %7 : vector<1x64xf32> to vector<8x64xf32>
    %128 = arith.addf %126, %127 : vector<8x64xf32>
    %129 = arith.mulf %128, %128 : vector<8x64xf32>
    %130 = arith.mulf %128, %129 : vector<8x64xf32>
    %cst_57 = arith.constant 4.471500e-02 : f32
    %131 = vector.broadcast %cst_57 : f32 to vector<8x64xf32>
    %132 = arith.mulf %131, %130 : vector<8x64xf32>
    %133 = arith.addf %128, %132 : vector<8x64xf32>
    %cst_58 = arith.constant 0.797884583 : f32
    %134 = vector.broadcast %cst_58 : f32 to vector<8x64xf32>
    %135 = arith.mulf %134, %133 : vector<8x64xf32>
    %136 = math.tanh %135 : vector<8x64xf32>
    %cst_59 = arith.constant 1.000000e+00 : f32
    %137 = vector.broadcast %cst_59 : f32 to vector<8x64xf32>
    %138 = arith.addf %137, %136 : vector<8x64xf32>
    %cst_60 = arith.constant 5.000000e-01 : f32
    %139 = vector.broadcast %cst_60 : f32 to vector<8x64xf32>
    %140 = arith.mulf %139, %138 : vector<8x64xf32>
    %141 = arith.mulf %128, %140 : vector<8x64xf32>
    %142 = arith.truncf %141 : vector<8x64xf32> to vector<8x64xbf16>
    %c0_61 = arith.constant 0 : index
    %c0_62 = arith.constant 0 : index
    %c0_63 = arith.constant 0 : index
    %143 = vector.load %arg6[%c0_61, %c0_62, %c0_63] : memref<2x64x32xbf16, #tpu.memory_space<vmem>>, vector<1x64x32xbf16>
    %144 = vector.shape_cast %143 : vector<1x64x32xbf16> to vector<64x32xbf16>
    %cst_64 = arith.constant dense<0.000000e+00> : vector<8x32xf32>
    %145 = tpu.matmul %142, %144, %cst_64 {dimension_numbers = #tpu.dot_dimension_numbers<[1], [0], [0], [1], [0, 0, 1, 1], [], []>} : vector<8x64xbf16>, vector<64x32xbf16>, vector<8x32xf32> -> vector<8x32xf32>
    %146 = vector.broadcast %8 : vector<1x32xf32> to vector<8x32xf32>
    %147 = arith.addf %145, %146 : vector<8x32xf32>
    %148 = arith.addf %147, %122 : vector<8x32xf32>
    %cst_65 = arith.constant dense<0.000000e+00> : vector<8xf32>
    %149 = vector.multi_reduction <add>, %148, %cst_65 [1] : vector<8x32xf32> to vector<8xf32>
    %150 = vector.shape_cast %149 : vector<8xf32> to vector<8x1xf32>
    %cst_66 = arith.constant 3.200000e+01 : f32
    %151 = vector.broadcast %cst_66 : f32 to vector<8x1xf32>
    %152 = arith.divf %150, %151 : vector<8x1xf32>
    %153 = vector.broadcast %152 : vector<8x1xf32> to vector<8x32xf32>
    %154 = arith.subf %148, %153 : vector<8x32xf32>
    %155 = arith.mulf %154, %154 : vector<8x32xf32>
    %cst_67 = arith.constant dense<0.000000e+00> : vector<8xf32>
    %156 = vector.multi_reduction <add>, %155, %cst_67 [1] : vector<8x32xf32> to vector<8xf32>
    %157 = vector.shape_cast %156 : vector<8xf32> to vector<8x1xf32>
    %cst_68 = arith.constant 3.200000e+01 : f32
    %158 = vector.broadcast %cst_68 : f32 to vector<8x1xf32>
    %159 = arith.divf %157, %158 : vector<8x1xf32>
    %160 = vector.broadcast %152 : vector<8x1xf32> to vector<8x32xf32>
    %161 = arith.subf %148, %160 : vector<8x32xf32>
    %cst_69 = arith.constant 9.99999996E-13 : f32
    %162 = vector.broadcast %cst_69 : f32 to vector<8x1xf32>
    %163 = arith.addf %159, %162 : vector<8x1xf32>
    %164 = math.rsqrt %163 : vector<8x1xf32>
    %165 = vector.broadcast %164 : vector<8x1xf32> to vector<8x32xf32>
    %166 = arith.mulf %161, %165 : vector<8x32xf32>
    %167 = vector.broadcast %11 : vector<1x32xf32> to vector<8x32xf32>
    %168 = arith.mulf %166, %167 : vector<8x32xf32>
    %169 = vector.broadcast %12 : vector<1x32xf32> to vector<8x32xf32>
    %170 = arith.addf %168, %169 : vector<8x32xf32>
    %c1 = arith.constant 1 : index
    %c0_70 = arith.constant 0 : index
    %c0_71 = arith.constant 0 : index
    %171 = vector.load %arg10[%c1, %c0_70, %c0_71] : memref<2x7x64xf32, #tpu.memory_space<vmem>>, vector<1x7x64xf32>
    %172 = vector.shape_cast %171 : vector<1x7x64xf32> to vector<7x64xf32>
    %173 = vector.extract_strided_slice %172 {offsets = [0, 0], sizes = [1, 32], strides = [1, 1]} : vector<7x64xf32> to vector<1x32xf32>
    %174 = vector.extract_strided_slice %172 {offsets = [1, 0], sizes = [1, 64], strides = [1, 1]} : vector<7x64xf32> to vector<1x64xf32>
    %175 = vector.extract_strided_slice %172 {offsets = [2, 0], sizes = [1, 32], strides = [1, 1]} : vector<7x64xf32> to vector<1x32xf32>
    %176 = vector.extract_strided_slice %172 {offsets = [3, 0], sizes = [1, 32], strides = [1, 1]} : vector<7x64xf32> to vector<1x32xf32>
    %177 = vector.extract_strided_slice %172 {offsets = [4, 0], sizes = [1, 32], strides = [1, 1]} : vector<7x64xf32> to vector<1x32xf32>
    %178 = vector.extract_strided_slice %172 {offsets = [5, 0], sizes = [1, 32], strides = [1, 1]} : vector<7x64xf32> to vector<1x32xf32>
    %179 = vector.extract_strided_slice %172 {offsets = [6, 0], sizes = [1, 32], strides = [1, 1]} : vector<7x64xf32> to vector<1x32xf32>
    %180 = arith.truncf %170 : vector<8x32xf32> to vector<8x32xbf16>
    %181 = vector.shape_cast %180 : vector<8x32xbf16> to vector<1x8x32xbf16>
    %182 = vector.shape_cast %181 : vector<1x8x32xbf16> to vector<1x8x32xbf16>
    %183 = vector.broadcast %182 : vector<1x8x32xbf16> to vector<4x8x32xbf16>
    %c1_72 = arith.constant 1 : index
    %c0_73 = arith.constant 0 : index
    %c0_74 = arith.constant 0 : index
    %c0_75 = arith.constant 0 : index
    %184 = vector.load %arg3[%c1_72, %c0_73, %c0_74, %c0_75] : memref<6x4x32x8xbf16, #tpu.memory_space<vmem>>, vector<1x4x32x8xbf16>
    %185 = vector.shape_cast %184 : vector<1x4x32x8xbf16> to vector<4x32x8xbf16>
    %cst_76 = arith.constant dense<0.000000e+00> : vector<4x8x8xf32>
    %186 = tpu.matmul %183, %185, %cst_76 {dimension_numbers = #tpu.dot_dimension_numbers<[2], [1], [1], [2], [0, 0, 0, 1, 1, 2], [0], [0]>} : vector<4x8x32xbf16>, vector<4x32x8xbf16>, vector<4x8x8xf32> -> vector<4x8x8xf32>
    %c3 = arith.constant 3 : index
    %c0_77 = arith.constant 0 : index
    %c0_78 = arith.constant 0 : index
    %c0_79 = arith.constant 0 : index
    %187 = vector.load %arg3[%c3, %c0_77, %c0_78, %c0_79] : memref<6x4x32x8xbf16, #tpu.memory_space<vmem>>, vector<1x4x32x8xbf16>
    %188 = vector.shape_cast %187 : vector<1x4x32x8xbf16> to vector<4x32x8xbf16>
    %cst_80 = arith.constant dense<0.000000e+00> : vector<4x8x8xf32>
    %189 = tpu.matmul %183, %188, %cst_80 {dimension_numbers = #tpu.dot_dimension_numbers<[2], [1], [1], [2], [0, 0, 0, 1, 1, 2], [0], [0]>} : vector<4x8x32xbf16>, vector<4x32x8xbf16>, vector<4x8x8xf32> -> vector<4x8x8xf32>
    %c5 = arith.constant 5 : index
    %c0_81 = arith.constant 0 : index
    %c0_82 = arith.constant 0 : index
    %c0_83 = arith.constant 0 : index
    %190 = vector.load %arg3[%c5, %c0_81, %c0_82, %c0_83] : memref<6x4x32x8xbf16, #tpu.memory_space<vmem>>, vector<1x4x32x8xbf16>
    %191 = vector.shape_cast %190 : vector<1x4x32x8xbf16> to vector<4x32x8xbf16>
    %cst_84 = arith.constant dense<0.000000e+00> : vector<4x8x8xf32>
    %192 = tpu.matmul %183, %191, %cst_84 {dimension_numbers = #tpu.dot_dimension_numbers<[2], [1], [1], [2], [0, 0, 0, 1, 1, 2], [0], [0]>} : vector<4x8x32xbf16>, vector<4x32x8xbf16>, vector<4x8x8xf32> -> vector<4x8x8xf32>
    %c1_85 = arith.constant 1 : index
    %c0_86 = arith.constant 0 : index
    %c0_87 = arith.constant 0 : index
    %c0_88 = arith.constant 0 : index
    %193 = vector.load %arg8[%c1_85, %c0_86, %c0_87, %c0_88] : memref<2x4x1x8xf32, #tpu.memory_space<vmem>>, vector<1x4x1x8xf32>
    %194 = vector.shape_cast %193 : vector<1x4x1x8xf32> to vector<4x1x8xf32>
    %195 = vector.broadcast %194 : vector<4x1x8xf32> to vector<4x8x8xf32>
    %196 = arith.addf %186, %195 : vector<4x8x8xf32>
    %197 = arith.truncf %196 : vector<4x8x8xf32> to vector<4x8x8xbf16>
    %198 = arith.truncf %189 : vector<4x8x8xf32> to vector<4x8x8xbf16>
    %cst_89 = arith.constant dense<0.000000e+00> : vector<4x8x8xf32>
    %199 = tpu.matmul %197, %198, %cst_89 {dimension_numbers = #tpu.dot_dimension_numbers<[2], [2], [1], [1], [0, 0, 0, 1, 1, 1], [0], [0]>} : vector<4x8x8xbf16>, vector<4x8x8xbf16>, vector<4x8x8xf32> -> vector<4x8x8xf32>
    %200 = arith.truncf %186 : vector<4x8x8xf32> to vector<4x8x8xbf16>
    %c1_90 = arith.constant 1 : index
    %c0_91 = arith.constant 0 : index
    %c0_92 = arith.constant 0 : index
    %c0_93 = arith.constant 0 : index
    %201 = vector.load %arg7[%c1_90, %c0_91, %c0_92, %c0_93] : memref<2x4x8x8xbf16, #tpu.memory_space<vmem>>, vector<1x4x8x8xbf16>
    %202 = vector.shape_cast %201 : vector<1x4x8x8xbf16> to vector<4x8x8xbf16>
    %cst_94 = arith.constant dense<0.000000e+00> : vector<4x8x8xf32>
    %203 = tpu.matmul %200, %202, %cst_94 {dimension_numbers = #tpu.dot_dimension_numbers<[2], [2], [1], [1], [0, 0, 0, 1, 1, 1], [0], [0]>} : vector<4x8x8xbf16>, vector<4x8x8xbf16>, vector<4x8x8xf32> -> vector<4x8x8xf32>
    %c1_95 = arith.constant 1 : index
    %c0_96 = arith.constant 0 : index
    %c0_97 = arith.constant 0 : index
    %c0_98 = arith.constant 0 : index
    %204 = vector.load %arg9[%c1_95, %c0_96, %c0_97, %c0_98] : memref<2x4x1x8xf32, #tpu.memory_space<vmem>>, vector<1x4x1x8xf32>
    %205 = vector.shape_cast %204 : vector<1x4x1x8xf32> to vector<4x1x8xf32>
    %206 = vector.broadcast %205 : vector<4x1x8xf32> to vector<4x8x8xf32>
    %207 = arith.addf %203, %206 : vector<4x8x8xf32>
    %208 = vector.extract_strided_slice %207 {offsets = [0, 1, 0], sizes = [4, 7, 8], strides = [1, 1, 1]} : vector<4x8x8xf32> to vector<4x7x8xf32>
    %cst_99 = arith.constant 0.000000e+00 : f32
    %209 = vector.broadcast %cst_99 : f32 to vector<4x1x8xf32>
    %210 = tpu.concatenate %208, %209 in 1 : vector<4x7x8xf32>, vector<4x1x8xf32> -> vector<4x8x8xf32>
    %cst_100 = arith.constant 0.000000e+00 : f32
    %211 = vector.broadcast %cst_100 : f32 to vector<4x8x1xf32>
    %212 = tpu.concatenate %207, %211, %210 in 2 : vector<4x8x8xf32>, vector<4x8x1xf32>, vector<4x8x8xf32> -> vector<4x8x17xf32>
    %213 = tpu.iota {dimensions = array<i32: 1>} : vector<4x8x17xi32>
    %c7_i32_101 = arith.constant 7 : i32
    %214 = vector.broadcast %c7_i32_101 : i32 to vector<4x8x17xi32>
    %215 = arith.subi %214, %213 : vector<4x8x17xi32>
    %216 = vector.extract_strided_slice %212 {offsets = [0, 0, 1], sizes = [4, 8, 16], strides = [1, 1, 1]} : vector<4x8x17xf32> to vector<4x8x16xf32>
    %217 = vector.extract_strided_slice %212 {offsets = [0, 0, 0], sizes = [4, 8, 1], strides = [1, 1, 1]} : vector<4x8x17xf32> to vector<4x8x1xf32>
    %218 = tpu.concatenate %216, %217 in 2 : vector<4x8x16xf32>, vector<4x8x1xf32> -> vector<4x8x17xf32>
    %c1_i32_102 = arith.constant 1 : i32
    %219 = vector.broadcast %c1_i32_102 : i32 to vector<4x8x17xi32>
    %220 = arith.andi %215, %219 : vector<4x8x17xi32>
    %c0_i32_103 = arith.constant 0 : i32
    %221 = vector.broadcast %c0_i32_103 : i32 to vector<4x8x17xi32>
    %222 = arith.cmpi ne, %220, %221 : vector<4x8x17xi32>
    %223 = arith.select %222, %218, %212 : vector<4x8x17xi1>, vector<4x8x17xf32>
    %224 = vector.extract_strided_slice %223 {offsets = [0, 0, 2], sizes = [4, 8, 15], strides = [1, 1, 1]} : vector<4x8x17xf32> to vector<4x8x15xf32>
    %225 = vector.extract_strided_slice %223 {offsets = [0, 0, 0], sizes = [4, 8, 2], strides = [1, 1, 1]} : vector<4x8x17xf32> to vector<4x8x2xf32>
    %226 = tpu.concatenate %224, %225 in 2 : vector<4x8x15xf32>, vector<4x8x2xf32> -> vector<4x8x17xf32>
    %c2_i32_104 = arith.constant 2 : i32
    %227 = vector.broadcast %c2_i32_104 : i32 to vector<4x8x17xi32>
    %228 = arith.andi %215, %227 : vector<4x8x17xi32>
    %c0_i32_105 = arith.constant 0 : i32
    %229 = vector.broadcast %c0_i32_105 : i32 to vector<4x8x17xi32>
    %230 = arith.cmpi ne, %228, %229 : vector<4x8x17xi32>
    %231 = arith.select %230, %226, %223 : vector<4x8x17xi1>, vector<4x8x17xf32>
    %232 = vector.extract_strided_slice %231 {offsets = [0, 0, 4], sizes = [4, 8, 13], strides = [1, 1, 1]} : vector<4x8x17xf32> to vector<4x8x13xf32>
    %233 = vector.extract_strided_slice %231 {offsets = [0, 0, 0], sizes = [4, 8, 4], strides = [1, 1, 1]} : vector<4x8x17xf32> to vector<4x8x4xf32>
    %234 = tpu.concatenate %232, %233 in 2 : vector<4x8x13xf32>, vector<4x8x4xf32> -> vector<4x8x17xf32>
    %c4_i32_106 = arith.constant 4 : i32
    %235 = vector.broadcast %c4_i32_106 : i32 to vector<4x8x17xi32>
    %236 = arith.andi %215, %235 : vector<4x8x17xi32>
    %c0_i32_107 = arith.constant 0 : i32
    %237 = vector.broadcast %c0_i32_107 : i32 to vector<4x8x17xi32>
    %238 = arith.cmpi ne, %236, %237 : vector<4x8x17xi32>
    %239 = arith.select %238, %234, %231 : vector<4x8x17xi1>, vector<4x8x17xf32>
    %240 = vector.extract_strided_slice %239 {offsets = [0, 0, 0], sizes = [4, 8, 8], strides = [1, 1, 1]} : vector<4x8x17xf32> to vector<4x8x8xf32>
    %241 = arith.addf %199, %240 : vector<4x8x8xf32>
    %cst_108 = arith.constant 0.353553385 : f32
    %242 = vector.broadcast %cst_108 : f32 to vector<4x8x8xf32>
    %243 = arith.mulf %241, %242 : vector<4x8x8xf32>
    %244 = vector.shape_cast %3 : vector<1x8xf32> to vector<1x1x8xf32>
    %245 = vector.broadcast %244 : vector<1x1x8xf32> to vector<4x8x8xf32>
    %246 = arith.addf %243, %245 : vector<4x8x8xf32>
    %cst_109 = arith.constant dense<0xFF800000> : vector<4x8xf32>
    %247 = vector.multi_reduction <maximumf>, %246, %cst_109 [2] : vector<4x8x8xf32> to vector<4x8xf32>
    %248 = vector.shape_cast %247 : vector<4x8xf32> to vector<4x8x1xf32>
    %249 = vector.broadcast %248 : vector<4x8x1xf32> to vector<4x8x8xf32>
    %250 = arith.subf %246, %249 : vector<4x8x8xf32>
    %251 = math.exp %250 : vector<4x8x8xf32>
    %cst_110 = arith.constant dense<0.000000e+00> : vector<4x8xf32>
    %252 = vector.multi_reduction <add>, %251, %cst_110 [2] : vector<4x8x8xf32> to vector<4x8xf32>
    %253 = vector.shape_cast %252 : vector<4x8xf32> to vector<4x8x1xf32>
    %254 = tpu.reciprocal %253 {approx = true} : vector<4x8x1xf32> -> vector<4x8x1xf32>
    %255 = vector.broadcast %254 : vector<4x8x1xf32> to vector<4x8x8xf32>
    %256 = arith.mulf %251, %255 : vector<4x8x8xf32>
    %257 = arith.truncf %256 : vector<4x8x8xf32> to vector<4x8x8xbf16>
    %258 = arith.truncf %192 : vector<4x8x8xf32> to vector<4x8x8xbf16>
    %cst_111 = arith.constant dense<0.000000e+00> : vector<4x8x8xf32>
    %259 = tpu.matmul %257, %258, %cst_111 {dimension_numbers = #tpu.dot_dimension_numbers<[2], [1], [1], [2], [0, 0, 0, 1, 1, 2], [0], [0]>} : vector<4x8x8xbf16>, vector<4x8x8xbf16>, vector<4x8x8xf32> -> vector<4x8x8xf32>
    %260 = arith.truncf %259 : vector<4x8x8xf32> to vector<4x8x8xbf16>
    %c1_112 = arith.constant 1 : index
    %c0_113 = arith.constant 0 : index
    %c0_114 = arith.constant 0 : index
    %c0_115 = arith.constant 0 : index
    %261 = vector.load %arg4[%c1_112, %c0_113, %c0_114, %c0_115] : memref<2x4x8x32xbf16, #tpu.memory_space<vmem>>, vector<1x4x8x32xbf16>
    %262 = vector.shape_cast %261 : vector<1x4x8x32xbf16> to vector<4x8x32xbf16>
    %cst_116 = arith.constant dense<0.000000e+00> : vector<4x8x32xf32>
    %263 = tpu.matmul %260, %262, %cst_116 {dimension_numbers = #tpu.dot_dimension_numbers<[2], [1], [1], [2], [0, 0, 0, 1, 1, 2], [0], [0]>} : vector<4x8x8xbf16>, vector<4x8x32xbf16>, vector<4x8x32xf32> -> vector<4x8x32xf32>
    %cst_117 = arith.constant dense<0.000000e+00> : vector<8x32xf32>
    %264 = vector.multi_reduction <add>, %263, %cst_117 [0] : vector<4x8x32xf32> to vector<8x32xf32>
    %265 = vector.broadcast %173 : vector<1x32xf32> to vector<8x32xf32>
    %266 = arith.addf %264, %265 : vector<8x32xf32>
    %267 = arith.addf %266, %170 : vector<8x32xf32>
    %cst_118 = arith.constant dense<0.000000e+00> : vector<8xf32>
    %268 = vector.multi_reduction <add>, %267, %cst_118 [1] : vector<8x32xf32> to vector<8xf32>
    %269 = vector.shape_cast %268 : vector<8xf32> to vector<8x1xf32>
    %cst_119 = arith.constant 3.200000e+01 : f32
    %270 = vector.broadcast %cst_119 : f32 to vector<8x1xf32>
    %271 = arith.divf %269, %270 : vector<8x1xf32>
    %272 = vector.broadcast %271 : vector<8x1xf32> to vector<8x32xf32>
    %273 = arith.subf %267, %272 : vector<8x32xf32>
    %274 = arith.mulf %273, %273 : vector<8x32xf32>
    %cst_120 = arith.constant dense<0.000000e+00> : vector<8xf32>
    %275 = vector.multi_reduction <add>, %274, %cst_120 [1] : vector<8x32xf32> to vector<8xf32>
    %276 = vector.shape_cast %275 : vector<8xf32> to vector<8x1xf32>
    %cst_121 = arith.constant 3.200000e+01 : f32
    %277 = vector.broadcast %cst_121 : f32 to vector<8x1xf32>
    %278 = arith.divf %276, %277 : vector<8x1xf32>
    %279 = vector.broadcast %271 : vector<8x1xf32> to vector<8x32xf32>
    %280 = arith.subf %267, %279 : vector<8x32xf32>
    %cst_122 = arith.constant 9.99999996E-13 : f32
    %281 = vector.broadcast %cst_122 : f32 to vector<8x1xf32>
    %282 = arith.addf %278, %281 : vector<8x1xf32>
    %283 = math.rsqrt %282 : vector<8x1xf32>
    %284 = vector.broadcast %283 : vector<8x1xf32> to vector<8x32xf32>
    %285 = arith.mulf %280, %284 : vector<8x32xf32>
    %286 = vector.broadcast %176 : vector<1x32xf32> to vector<8x32xf32>
    %287 = arith.mulf %285, %286 : vector<8x32xf32>
    %288 = vector.broadcast %177 : vector<1x32xf32> to vector<8x32xf32>
    %289 = arith.addf %287, %288 : vector<8x32xf32>
    %290 = arith.truncf %289 : vector<8x32xf32> to vector<8x32xbf16>
    %c1_123 = arith.constant 1 : index
    %c0_124 = arith.constant 0 : index
    %c0_125 = arith.constant 0 : index
    %291 = vector.load %arg5[%c1_123, %c0_124, %c0_125] : memref<2x32x64xbf16, #tpu.memory_space<vmem>>, vector<1x32x64xbf16>
    %292 = vector.shape_cast %291 : vector<1x32x64xbf16> to vector<32x64xbf16>
    %cst_126 = arith.constant dense<0.000000e+00> : vector<8x64xf32>
    %293 = tpu.matmul %290, %292, %cst_126 {dimension_numbers = #tpu.dot_dimension_numbers<[1], [0], [0], [1], [0, 0, 1, 1], [], []>} : vector<8x32xbf16>, vector<32x64xbf16>, vector<8x64xf32> -> vector<8x64xf32>
    %294 = vector.broadcast %174 : vector<1x64xf32> to vector<8x64xf32>
    %295 = arith.addf %293, %294 : vector<8x64xf32>
    %296 = arith.mulf %295, %295 : vector<8x64xf32>
    %297 = arith.mulf %295, %296 : vector<8x64xf32>
    %cst_127 = arith.constant 4.471500e-02 : f32
    %298 = vector.broadcast %cst_127 : f32 to vector<8x64xf32>
    %299 = arith.mulf %298, %297 : vector<8x64xf32>
    %300 = arith.addf %295, %299 : vector<8x64xf32>
    %cst_128 = arith.constant 0.797884583 : f32
    %301 = vector.broadcast %cst_128 : f32 to vector<8x64xf32>
    %302 = arith.mulf %301, %300 : vector<8x64xf32>
    %303 = math.tanh %302 : vector<8x64xf32>
    %cst_129 = arith.constant 1.000000e+00 : f32
    %304 = vector.broadcast %cst_129 : f32 to vector<8x64xf32>
    %305 = arith.addf %304, %303 : vector<8x64xf32>
    %cst_130 = arith.constant 5.000000e-01 : f32
    %306 = vector.broadcast %cst_130 : f32 to vector<8x64xf32>
    %307 = arith.mulf %306, %305 : vector<8x64xf32>
    %308 = arith.mulf %295, %307 : vector<8x64xf32>
    %309 = arith.truncf %308 : vector<8x64xf32> to vector<8x64xbf16>
    %c1_131 = arith.constant 1 : index
    %c0_132 = arith.constant 0 : index
    %c0_133 = arith.constant 0 : index
    %310 = vector.load %arg6[%c1_131, %c0_132, %c0_133] : memref<2x64x32xbf16, #tpu.memory_space<vmem>>, vector<1x64x32xbf16>
    %311 = vector.shape_cast %310 : vector<1x64x32xbf16> to vector<64x32xbf16>
    %cst_134 = arith.constant dense<0.000000e+00> : vector<8x32xf32>
    %312 = tpu.matmul %309, %311, %cst_134 {dimension_numbers = #tpu.dot_dimension_numbers<[1], [0], [0], [1], [0, 0, 1, 1], [], []>} : vector<8x64xbf16>, vector<64x32xbf16>, vector<8x32xf32> -> vector<8x32xf32>
    %313 = vector.broadcast %175 : vector<1x32xf32> to vector<8x32xf32>
    %314 = arith.addf %312, %313 : vector<8x32xf32>
    %315 = arith.addf %314, %289 : vector<8x32xf32>
    %cst_135 = arith.constant dense<0.000000e+00> : vector<8xf32>
    %316 = vector.multi_reduction <add>, %315, %cst_135 [1] : vector<8x32xf32> to vector<8xf32>
    %317 = vector.shape_cast %316 : vector<8xf32> to vector<8x1xf32>
    %cst_136 = arith.constant 3.200000e+01 : f32
    %318 = vector.broadcast %cst_136 : f32 to vector<8x1xf32>
    %319 = arith.divf %317, %318 : vector<8x1xf32>
    %320 = vector.broadcast %319 : vector<8x1xf32> to vector<8x32xf32>
    %321 = arith.subf %315, %320 : vector<8x32xf32>
    %322 = arith.mulf %321, %321 : vector<8x32xf32>
    %cst_137 = arith.constant dense<0.000000e+00> : vector<8xf32>
    %323 = vector.multi_reduction <add>, %322, %cst_137 [1] : vector<8x32xf32> to vector<8xf32>
    %324 = vector.shape_cast %323 : vector<8xf32> to vector<8x1xf32>
    %cst_138 = arith.constant 3.200000e+01 : f32
    %325 = vector.broadcast %cst_138 : f32 to vector<8x1xf32>
    %326 = arith.divf %324, %325 : vector<8x1xf32>
    %327 = vector.broadcast %319 : vector<8x1xf32> to vector<8x32xf32>
    %328 = arith.subf %315, %327 : vector<8x32xf32>
    %cst_139 = arith.constant 9.99999996E-13 : f32
    %329 = vector.broadcast %cst_139 : f32 to vector<8x1xf32>
    %330 = arith.addf %326, %329 : vector<8x1xf32>
    %331 = math.rsqrt %330 : vector<8x1xf32>
    %332 = vector.broadcast %331 : vector<8x1xf32> to vector<8x32xf32>
    %333 = arith.mulf %328, %332 : vector<8x32xf32>
    %334 = vector.broadcast %178 : vector<1x32xf32> to vector<8x32xf32>
    %335 = arith.mulf %333, %334 : vector<8x32xf32>
    %336 = vector.broadcast %179 : vector<1x32xf32> to vector<8x32xf32>
    %337 = arith.addf %335, %336 : vector<8x32xf32>
    %c0_140 = arith.constant 0 : index
    %c0_141 = arith.constant 0 : index
    %c0_142 = arith.constant 0 : index
    %338 = vector.load %arg11[%c0_140, %c0_141, %c0_142] : memref<1x8x32xf32, #tpu.memory_space<vmem>>, vector<1x8x32xf32>
    %339 = vector.shape_cast %338 : vector<1x8x32xf32> to vector<8x32xf32>
    %340 = vector.shape_cast %337 : vector<8x32xf32> to vector<1x8x32xf32>
    tpu.vector_store %arg11[%c0_140, %c0_141, %c0_142], %340 {strides = array<i32>} : memref<1x8x32xf32, #tpu.memory_space<vmem>>, vector<1x8x32xf32>,
    return
  }
  func.func @transform_0(%arg0: i32) -> (i32, i32, i32) {
    %c0_i32 = arith.constant 0 : i32
    %c0_i32_0 = arith.constant 0 : i32
    %c0_i32_1 = arith.constant 0 : i32
    return %arg0, %c0_i32, %c0_i32_0 : i32, i32, i32
  }
  func.func @transform_1(%arg0: i32) -> (i32, i32, i32) {
    %c0_i32 = arith.constant 0 : i32
    %c0_i32_0 = arith.constant 0 : i32
    %c0_i32_1 = arith.constant 0 : i32
    return %arg0, %c0_i32, %c0_i32_0 : i32, i32, i32
  }
  func.func @transform_2(%arg0: i32) -> (i32, i32, i32, i32) {
    %c0_i32 = arith.constant 0 : i32
    %c0_i32_0 = arith.constant 0 : i32
    %c0_i32_1 = arith.constant 0 : i32
    %c0_i32_2 = arith.constant 0 : i32
    %c0_i32_3 = arith.constant 0 : i32
    return %c0_i32, %c0_i32_0, %c0_i32_1, %c0_i32_2 : i32, i32, i32, i32
  }
  func.func @transform_3(%arg0: i32) -> (i32, i32, i32, i32) {
    %c0_i32 = arith.constant 0 : i32
    %c0_i32_0 = arith.constant 0 : i32
    %c0_i32_1 = arith.constant 0 : i32
    %c0_i32_2 = arith.constant 0 : i32
    %c0_i32_3 = arith.constant 0 : i32
    return %c0_i32, %c0_i32_0, %c0_i32_1, %c0_i32_2 : i32, i32, i32, i32
  }
  func.func @transform_4(%arg0: i32) -> (i32, i32, i32) {
    %c0_i32 = arith.constant 0 : i32
    %c0_i32_0 = arith.constant 0 : i32
    %c0_i32_1 = arith.constant 0 : i32
    %c0_i32_2 = arith.constant 0 : i32
    return %c0_i32, %c0_i32_0, %c0_i32_1 : i32, i32, i32
  }
  func.func @transform_5(%arg0: i32) -> (i32, i32, i32) {
    %c0_i32 = arith.constant 0 : i32
    %c0_i32_0 = arith.constant 0 : i32
    %c0_i32_1 = arith.constant 0 : i32
    %c0_i32_2 = arith.constant 0 : i32
    return %c0_i32, %c0_i32_0, %c0_i32_1 : i32, i32, i32
  }
  func.func @transform_6(%arg0: i32) -> (i32, i32, i32, i32) {
    %c0_i32 = arith.constant 0 : i32
    %c0_i32_0 = arith.constant 0 : i32
    %c0_i32_1 = arith.constant 0 : i32
    %c0_i32_2 = arith.constant 0 : i32
    %c0_i32_3 = arith.constant 0 : i32
    return %c0_i32, %c0_i32_0, %c0_i32_1, %c0_i32_2 : i32, i32, i32, i32
  }
  func.func @transform_7(%arg0: i32) -> (i32, i32, i32, i32) {
    %c0_i32 = arith.constant 0 : i32
    %c0_i32_0 = arith.constant 0 : i32
    %c0_i32_1 = arith.constant 0 : i32
    %c0_i32_2 = arith.constant 0 : i32
    %c0_i32_3 = arith.constant 0 : i32
    return %c0_i32, %c0_i32_0, %c0_i32_1, %c0_i32_2 : i32, i32, i32, i32
  }
  func.func @transform_8(%arg0: i32) -> (i32, i32, i32, i32) {
    %c0_i32 = arith.constant 0 : i32
    %c0_i32_0 = arith.constant 0 : i32
    %c0_i32_1 = arith.constant 0 : i32
    %c0_i32_2 = arith.constant 0 : i32
    %c0_i32_3 = arith.constant 0 : i32
    return %c0_i32, %c0_i32_0, %c0_i32_1, %c0_i32_2 : i32, i32, i32, i32
  }
  func.func @transform_9(%arg0: i32) -> (i32, i32, i32) {
    %c0_i32 = arith.constant 0 : i32
    %c0_i32_0 = arith.constant 0 : i32
    %c0_i32_1 = arith.constant 0 : i32
    %c0_i32_2 = arith.constant 0 : i32
    return %c0_i32, %c0_i32_0, %c0_i32_1 : i32, i32, i32
  }
  func.func @transform_10(%arg0: i32) -> (i32, i32, i32) {
    %c0_i32 = arith.constant 0 : i32
    %c0_i32_0 = arith.constant 0 : i32
    %c0_i32_1 = arith.constant 0 : i32
    return %arg0, %c0_i32, %c0_i32_0 : i32, i32, i32
  }
}

</mosaic_0001>

<bundles_post_ra>
// kernel: tpu_custom_call.1
= control target key start
LH: loop header
LB: loop body
LE: loop exit
PB: predicated region body
PF: predicated region fallthrough
CT: control target
= control target key end

     0   :  { %s6455_s0 = inlined_call_operand.vmem [shape: f32[2,8,32], index: 0, kind: input, shape index: {}]   ;;  %s6456_s1 = inlined_call_operand.vmem [shape: f32[2,1,8], index: 1, kind: input, shape index: {}]   ;;  %s6457_s2 = inlined_call_operand.vmem [shape: bf16[6,4,32,8], index: 2, kind: input, shape index: {}]   ;;  %s6458_s3 = inlined_call_operand.vmem [shape: bf16[2,4,8,32], index: 3, kind: input, shape index: {}]   ;;  %s6459_s4 = inlined_call_operand.vmem [shape: bf16[2,32,64], index: 4, kind: input, shape index: {}]   ;;  %s6460_s5 = inlined_call_operand.vmem [shape: bf16[2,64,32], index: 5, kind: input, shape index: {}]   ;;  %s6461_s6 = inlined_call_operand.vmem [shape: bf16[2,4,8,8], index: 6, kind: input, shape index: {}]   ;;  %s6462_s7 = inlined_call_operand.vmem [shape: f32[2,4,1,8], index: 7, kind: input, shape index: {}]   ;;  %s6463_s8 = inlined_call_operand.vmem [shape: f32[2,4,1,8], index: 8, kind: input, shape index: {}]   ;;  %s6464_s9 = inlined_call_operand.vmem [shape: f32[2,7,64], index: 9, kind: input, shape index: {}]   ;;  %s6465_s10 = inlined_call_operand.hbm [shape: f32[2,8,32], index: 10, kind: output, shape index: {}]  }
   0x1   :  { %6476 = sst [smem:[#allocation5_spill]] %s6455_s0 }
   0x2   :  { %15 = vsyncpa [#allocation3], 0 }
   0x3   :  { %17 = vsyncpa [#allocation3 + $0x1], 0  ;;  %s5441_s13 = smov 0   ;;  %s5443_s14 = smov 0  }
   0x4   :  { %s5445_s15 = smov 0   ;;  %s5447_s16 = smov 0  }
   0x5 LB: > { %s5462_s17 = sadd.s32 4294967295, %s5374_s16   ;;  %s4328_s18 = sadd.s32 4294967294, %s5374_s16   ;;  %s5374_s16 = sphi %s5447_s16, %s6494_s16   ;;  %s5370_s15 = sphi %s5445_s15, %s6493_s15   ;;  %s5366_s14 = sphi %s5443_s14, %s6492_s14   ;;  %s5362_s13 = sphi %s5441_s13, %s6491_s13  }
   0x6   : > { %s5466_s19 = sadd.s32 1, %s5374_s16   ;;  %s250_s20 = sadd.s32 1, %s5370_s15 }
   0x7   : > { %s247_s21 = ssub.s32 %s5374_s16, %s5466_s19  ;;  %p260_p0 = scmp.ne.s32.totalorder %s5370_s15, %s5366_s14 }
   0x8   : > { %p248_p1 = scmp.eq.s32.totalorder %s247_s21, 0  ;;  %p261_p2 = scmp.eq.s32.totalorder %s5462_s17, 1 }
   0x9   : > { %p266_p3 = scmp.ne.s32.totalorder %s5366_s14, %s5362_s13  ;;  %p267_p4 = scmp.eq.s32.totalorder %s4328_s18, 1 }
   0xa   : > { %s5477_s22 = scalar_select %p248_p1, %s5370_s15, %s250_s20  }
   0xb   : > { %p5479_p5 = por %p261_p2, %p260_p0  ;;  %p5483_p6 = por %p267_p4, %p266_p3 }
   0xc   : > { %p4331_p7 = scmp.ge.s32.totalorder %s5374_s16, 1  ;;  %p322_p8 = scmp.lt.s32.totalorder %s5374_s16, 3 }
   0xe   : > { %p323_p9 = pnand %p4331_p7, %p322_p8 }
   0xf   : > { %p362_p10 = scmp.lt.s32.totalorder (!%p323_p9), %s5462_s17, 1  ;;  %s6479_s0 = sld [smem:[#allocation5_spill]] (!%p323_p9) }
  0x10   : > { %326 = sbr.rel (%p323_p9) target bundleno = 5311 (0x14bf), region = 60  ;;  %s5378_s11 = smov (!%p323_p9), 9  }
  0x11   : > { %s5379_s29 = smov (!%p323_p9), 127   ;;  %s6474_s30 = smov (!%p323_p9), 16  }
  0x12   : > { %s6472_s12 = smov (!%p323_p9), 15   ;;  %s6470_s21 = smov (!%p323_p9), 13  }
  0x13   : > { %s6468_s25 = smov (!%p323_p9), 124   ;;  %s4581_s27 = sshll.u32 (!%p323_p9), %s5462_s17, 7 }
  0x15   : > { %v5208_v0 = vld [vmem:[%s6457_s2 + $0x8] sm:$0xff]   ;;  %v5376_v1 = vmov 0.0   ;;  %v5210_v3 = vld [vmem:[%s6457_s2] sm:$0xff]   ;;  %vm5377_vm0 = vmmov 0   ;;  %s5511_s18 = scalar_select %p362_p10, %s5462_s17, 1  ;;  %v5212_v5 = vld [vmem:[%s6457_s2 + $0x18] sm:$0xff]  }
  0x16   : > { %4736 = vmatprep.subr.bf16.mxu1 %v5376_v1  ;;  %4752 = vmatprep.subr.bf16.mxu0 %v5376_v1  ;;  %v5209_v2 = vld [vmem:[%s6457_s2 + $0x28] sm:$0xff]   ;;  %v5211_v4 = vld [vmem:[%s6457_s2 + $0x20] sm:$0xff]   ;;  %vm402_vm1 = vcmask 261120   ;;  %v5214_v9 = vld [vmem:[%s6457_s2 + $0x10] sm:$0xff]   ;;  %vm1128_vm2 = vcmask 64512   ;;  %vm1728_vm3 = vcmask 1043456  }
  0x17   : > { %4737 = vmatpush3.bf16.msra.mxu1 %v5208_v0  ;;  %4740 = vmatprep.mubr.msk.bf16.mxu1 %vm5377_vm0, %v5376_v1  ;;  %s4333_s20 = sshll.u32 %s5511_s18, 3  ;;  %v5213_v6 = vld [vmem:[%s6457_s2 + $0x88] sm:$0xff]   ;;  %v5215_v10 = vld [vmem:[%s6457_s2 + $0x80] sm:$0xff]   ;;  %v5216_v11 = vld [vmem:[%s6457_s2 + $0x38] sm:$0xff]   ;;  %vm1325_vm4 = vcmask 1046528   ;;  %vm1350_vm5 = vcmask 72704  }
  0x18   : > { %4753 = vmatpush3.bf16.msra.mxu0 %v5209_v2  ;;  %4738 = vmatprep.subr.bf16.mxu1 %v5376_v1  ;;  %s5520_s28 = scalar_lea.vmem %s6479_s0, %s4333_s20  ;;  %v5217_v12 = vld [vmem:[%s6457_s2 + $0xa8] sm:$0xff]   ;;  %v5218_v13 = vld [vmem:[%s6457_s2 + $0x30] sm:$0xff]   ;;  %v5219_v14 = vld [vmem:[%s6457_s2 + $0xa0] sm:$0xff]   ;;  %vm1386_vm6 = vcmask 130048   ;;  %s6466_s20 = smov 126   ;;  %vm1425_vm8 = vcmask 121856  }
  0x19   : > { %4754 = vmatprep.subr.bf16.mxu0 %v5376_v1  ;;  %4756 = vmatprep.mubr.msk.bf16.mxu0 %vm5377_vm0, %v5376_v1  ;;  %v370_v7 = vld [vmem:[%s5520_s28] sm:$0xff]  ;;  %v5220_v15 = vld [vmem:[%s6457_s2 + $0x98] sm:$0xff]   ;;  %v5224_v17 = vld [vmem:[%s6457_s2 + $0x108] sm:$0xff]   ;;  %vm1464_vm10 = vcmask 105472   ;;  %vm2249_vm12 = vcmask 523264  }
  0x1a   : > { %v5528_v8 = vpack.c.bf16 %v370_v7, %v370_v7  ;;  %v1096_v16 = vld [vmem:[%s6461_s6] sm:$0xf]  ;;  %v5221_v19 = vld [vmem:[%s6457_s2 + $0x90] sm:$0xff]   ;;  %v5222_v21 = vld [vmem:[%s6457_s2 + $0xb8] sm:$0xff]  }
  0x1b   : > { %4739 = vmatpush3.bf16.msra.mxu1 %v5210_v3  ;;  %v1133_v18 = vsel %vm1128_vm2, %v1096_v16, 0  ;;  %v5225_v20 = vld [vmem:[%s6457_s2 + $0x100] sm:$0xff]   ;;  %v5228_v22 = vld [vmem:[%s6457_s2 + $0x128] sm:$0xff]   ;;  %v5223_v23 = vld [vmem:[%s6457_s2 + $0xb0] sm:$0xff]  }
  0x1c   : > { %4755 = vmatpush3.bf16.msra.mxu0 %v5211_v4  ;;  %4744 = vmatprep.subr.bf16.mxu1 %v5376_v1  ;;  %v5229_v24 = vld [vmem:[%s6457_s2 + $0x120] sm:$0xff]   ;;  %v5226_v25 = vld [vmem:[%s6457_s2 + $0x118] sm:$0xff]   ;;  %v5227_v26 = vld [vmem:[%s6457_s2 + $0x110] sm:$0xff]  }
  0x1d   : > { %4768 = vmatprep.subr.bf16.mxu0 %v5376_v1  ;;  %v5230_v27 = vld [vmem:[%s6457_s2 + $0x138] sm:$0xff]   ;;  %v5231_v28 = vld [vmem:[%s6457_s2 + $0x130] sm:$0xff]   ;;  %v1097_v29 = vld [vmem:[%s6461_s6 + $0x4] sm:$0xf] }
  0x1e   : > { %4741 = vmatmul.mubr.msk.bf16.vlgmr.msra.gmra.mxu1 %vm402_vm1, %v5528_v8  ;;  %v1179_v30 = vsel %vm1128_vm2, %v1097_v29, 0  ;;  %v1098_v31 = vld [vmem:[%s6461_s6 + $0x8] sm:$0xf]  ;;  %v1099_v42 = vld [vmem:[%s6461_s6 + $0xc] sm:$0xf] }
  0x1f   : > { %4757 = vmatmul.mubr.msk.bf16.vlgmr.msra.gmra.mxu0 %vm402_vm1, %v5528_v8  ;;  %4745 = vmatpush3.bf16.msra.mxu1 %v5212_v5  ;;  %v1225_v35 = vsel %vm1128_vm2, %v1098_v31, 0  ;;  %v1271_v48 = vsel %vm1128_vm2, %v1099_v42, 0  ;;  %v4402_v49 = vld [vmem:[%s6462_s7] ss:$0 sm:$0xff]  ;;  %v4404_v63 = vld [vmem:[%s6462_s7 + $0x2] ss:$0 sm:$0xff] }
  0x20   : > { %4769 = vmatpush3.bf16.msra.mxu0 %v5213_v6  ;;  %4746 = vmatprep.subr.bf16.mxu1 %v5376_v1 }
  0x21   : > { %4770 = vmatprep.subr.bf16.mxu0 %v5376_v1  ;;  %4748 = vmatprep.mubr.msk.bf16.mxu1 %vm5377_vm0, %v5376_v1 }
  0x22   : > { %4772 = vmatprep.mubr.msk.bf16.mxu0 %vm5377_vm0, %v5376_v1 }
  0x23   : > { %4747 = vmatpush3.bf16.msra.mxu1 %v5214_v9 }
  0x24   : > { %4771 = vmatpush3.bf16.msra.mxu0 %v5215_v10  ;;  %4760 = vmatprep.subr.bf16.mxu1 %v5376_v1 }
  0x25   : > { %4784 = vmatprep.subr.bf16.mxu0 %v5376_v1 }
  0x26   : > { %4749 = vmatmul.mubr.msk.bf16.vlgmr.msra.gmra.mxu1 %vm402_vm1, %v5528_v8 }
  0x27   : > { %4773 = vmatmul.mubr.msk.bf16.vlgmr.msra.gmra.mxu0 %vm402_vm1, %v5528_v8  ;;  %4761 = vmatpush3.bf16.msra.mxu1 %v5216_v11 }
  0x28   : > { %4785 = vmatpush3.bf16.msra.mxu0 %v5217_v12  ;;  %4762 = vmatprep.subr.bf16.mxu1 %v5376_v1  ;;  %v4403_v12 = vld [vmem:[%s6462_s7 + $0x1] ss:$0 sm:$0xff] }
  0x29   : > { %4786 = vmatprep.subr.bf16.mxu0 %v5376_v1  ;;  %4764 = vmatprep.mubr.msk.bf16.mxu1 %vm5377_vm0, %v5376_v1 }
  0x2a   : > { %4788 = vmatprep.mubr.msk.bf16.mxu0 %vm5377_vm0, %v5376_v1 }
  0x2b   : > { %4763 = vmatpush3.bf16.msra.mxu1 %v5218_v13 }
  0x2c   : > { %4787 = vmatpush3.bf16.msra.mxu0 %v5219_v14  ;;  %4776 = vmatprep.subr.bf16.mxu1 %v5376_v1 }
  0x2d   : > { %4800 = vmatprep.subr.bf16.mxu0 %v5376_v1 }
  0x2e   : > { %4765 = vmatmul.mubr.msk.bf16.vlgmr.msra.gmra.mxu1 %vm402_vm1, %v5528_v8 }
  0x2f   : > { %4789 = vmatmul.mubr.msk.bf16.vlgmr.msra.gmra.mxu0 %vm402_vm1, %v5528_v8  ;;  %4777 = vmatpush3.bf16.msra.mxu1 %v5220_v15 }
  0x30   : > { %4780 = vmatprep.mubr.msk.bf16.mxu1 %vm5377_vm0, %v5376_v1  ;;  %4778 = vmatprep.subr.bf16.mxu1 %v5376_v1 }
  0x31   : > { %4801 = vmatpush3.bf16.msra.mxu0 %v5224_v17  ;;  %4804 = vmatprep.mubr.msk.bf16.mxu0 %vm5377_vm0, %v5376_v1 }
  0x32   : > { %4802 = vmatprep.subr.bf16.mxu0 %v5376_v1 }
  0x33   : > { %4779 = vmatpush3.bf16.msra.mxu1 %v5221_v19 }
  0x34   : > { %4792 = vmatprep.subr.bf16.mxu1 %v5376_v1 }
  0x35   : > { %4803 = vmatpush3.bf16.msra.mxu0 %v5225_v20 }
  0x36   : > { %4816 = vmatprep.subr.bf16.mxu0 %v5376_v1  ;;  %4781 = vmatmul.mubr.msk.bf16.vlgmr.msra.gmra.mxu1 %vm402_vm1, %v5528_v8 }
  0x37   : > { %4793 = vmatpush3.bf16.msra.mxu1 %v5222_v21  ;;  %4796 = vmatprep.mubr.msk.bf16.mxu1 %vm5377_vm0, %v5376_v1 }
  0x38   : > { %4794 = vmatprep.subr.bf16.mxu1 %v5376_v1  ;;  %4805 = vmatmul.mubr.msk.bf16.vlgmr.msra.gmra.mxu0 %vm402_vm1, %v5528_v8 }
  0x39   : > { %4817 = vmatpush3.bf16.msra.mxu0 %v5228_v22  ;;  %4820 = vmatprep.mubr.msk.bf16.mxu0 %vm5377_vm0, %v5376_v1 }
  0x3a   : > { %4818 = vmatprep.subr.bf16.mxu0 %v5376_v1 }
  0x3b   : > { %4795 = vmatpush3.bf16.msra.mxu1 %v5223_v23 }
  0x3c   : > { %4808 = vmatprep.subr.bf16.mxu1 %v5376_v1 }
  0x3d   : > { %4819 = vmatpush3.bf16.msra.mxu0 %v5229_v24 }
  0x3e   : > { %4797 = vmatmul.mubr.msk.bf16.vlgmr.msra.gmra.mxu1 %vm402_vm1, %v5528_v8  ;;  %4832 = vmatprep.subr.bf16.mxu0 %v5376_v1 }
  0x3f   : > { %4809 = vmatpush3.bf16.msra.mxu1 %v5226_v25  ;;  %4812 = vmatprep.mubr.msk.bf16.mxu1 %vm5377_vm0, %v5376_v1 }
  0x40   : > { %4810 = vmatprep.subr.bf16.mxu1 %v5376_v1  ;;  %4821 = vmatmul.mubr.msk.bf16.vlgmr.msra.gmra.mxu0 %vm402_vm1, %v5528_v8 }
  0x41   : > { %4833 = vmatpush3.bf16.xpose.msra.mxu0 %v1133_v18  ;;  %4834 = vmatprep.mubr.msk.bf16.mxu0 %vm5377_vm0, %v5376_v1 }
  0x42   : > { %4844 = vmatprep.subr.bf16.mxu0 %v5376_v1 }
  0x43   : > { %4811 = vmatpush3.bf16.msra.mxu1 %v5227_v26 }
  0x44   : > { %4824 = vmatprep.subr.bf16.mxu1 %v5376_v1 }
  0x46   : > { %4813 = vmatmul.mubr.msk.bf16.vlgmr.msra.gmra.mxu1 %vm402_vm1, %v5528_v8 }
  0x47   : > { %4825 = vmatpush3.bf16.msra.mxu1 %v5230_v27  ;;  %4828 = vmatprep.mubr.msk.bf16.mxu1 %vm5377_vm0, %v5376_v1  ;;  %v4405_v27 = vld [vmem:[%s6462_s7 + $0x3] ss:$0 sm:$0xff] }
  0x48   : > { %4826 = vmatprep.subr.bf16.mxu1 %v5376_v1 }
  0x4b   : > { %4827 = vmatpush3.bf16.msra.mxu1 %v5231_v28 }
  0x4c   : > { %4838 = vmatprep.subr.bf16.mxu1 %v5376_v1 }
  0x4e   : > { %4829 = vmatmul.mubr.msk.bf16.vlgmr.msra.gmra.mxu1 %vm402_vm1, %v5528_v8 }
  0x4f   : > { %4840 = vmatprep.mubr.msk.bf16.mxu1 %vm5377_vm0, %v5376_v1  ;;  %4839 = vmatpush3.bf16.xpose.msra.mxu1 %v1179_v30 }
  0x50   : > { %4850 = vmatprep.subr.bf16.mxu1 %v5376_v1 }
  0xde   : > { %v440_v32 = vpop.f32.mrf.mxu1 }
  0xdf   : > { %v544_v33 = vpop.f32.mrf.mxu0  ;;  %v1092_v34 = vpack.c.bf16 %v440_v32, %v440_v32  ;;  %v1080_v55 = vadd.f32 %v4402_v49, %v440_v32 }
  0xe0   : > { %v4742_v36 = vpop.f32.mrf.mxu1  ;;  %v1094_v43 = vpack.c.bf16 %v544_v33, %v544_v33  ;;  %v1082_v6 = vadd.f32 %v4404_v63, %v544_v33 }
  0xe1   : > { %v4758_v37 = vpop.f32.mrf.mxu0  ;;  %4835 = vmatmul.mubr.msk.bf16.vlgmr.msra.gmra.mxu0 %vm1128_vm2, %v1092_v34  ;;  %v1084_v60 = vpack.c.bf16 %v1080_v55, %v1080_v55 }
  0xe2   : > { %v443_v38 = vpop.f32.mrf.mxu1  ;;  %4845 = vmatpush3.bf16.xpose.msra.mxu0 %v1225_v35  ;;  %4846 = vmatprep.mubr.msk.bf16.mxu0 %vm5377_vm0, %v5376_v1  ;;  %v1086_v10 = vpack.c.bf16 %v1082_v6, %v1082_v6 }
  0xe3   : > { %v547_v39 = vpop.f32.mrf.mxu0  ;;  %4856 = vmatprep.subr.bf16.mxu0 %v5376_v1 }
  0xe4   : > { %v4743_v40 = vpop.f32.mrf.mxu1 }
  0xe5   : > { %v4759_v41 = vpop.f32.mrf.mxu0 }
  0xe6   : > { %v492_v44 = vpop.f32.mrf.mxu1 }
  0xe7   : > { %v665_v45 = vpop.f32.mrf.mxu0  ;;  %v1093_v46 = vpack.c.bf16 %v492_v44, %v492_v44  ;;  %v1081_v19 = vadd.f32 %v4403_v12, %v492_v44 }
  0xe8   : > { %v1088_v47 = vpack.c.bf16 %v665_v45, %v665_v45  ;;  %v4750_v50 = vpop.f32.mrf.mxu1 }
  0xe9   : > { %v4774_v51 = vpop.f32.mrf.mxu0  ;;  %4841 = vmatmul.mubr.msk.bf16.vlgmr.msra.gmra.mxu1 %vm1128_vm2, %v1093_v46  ;;  %4847 = vmatmul.mubr.msk.bf16.vlgmr.msra.gmra.mxu0 %vm1128_vm2, %v1094_v43  ;;  %v1085_v25 = vpack.c.bf16 %v1081_v19, %v1081_v19 }
  0xea   : > { %v1479_v52 = vsel %vm1128_vm2, %v1088_v47, 0  ;;  %v495_v53 = vpop.f32.mrf.mxu1  ;;  %4851 = vmatpush3.bf16.xpose.msra.mxu1 %v1271_v48  ;;  %4852 = vmatprep.mubr.msk.bf16.mxu1 %vm5377_vm0, %v5376_v1  ;;  %v4406_v48 = vld [vmem:[%s6463_s8] ss:$0 sm:$0xff] }
  0xeb   : > { %v668_v54 = vpop.f32.mrf.mxu0  ;;  %4857 = vmatpush3.bf16.xpose.msra.mxu0 %v1479_v52  ;;  %4858 = vmatprep.mubr.msk.bf16.mxu0 %vm5377_vm0, %v5376_v1 }
  0xec   : > { %v4751_v56 = vpop.f32.mrf.mxu1  ;;  %4868 = vmatprep.subr.bf16.mxu0 %v5376_v1  ;;  %4862 = vmatprep.subr.bf16.mxu1 %v5376_v1 }
  0xed   : > { %v4775_v57 = vpop.f32.mrf.mxu0  ;;  %v4407_v56 = vld [vmem:[%s6463_s8 + $0x1] ss:$0 sm:$0xff] }
  0xee   : > { %v596_v58 = vpop.f32.mrf.mxu1  ;;  %v4408_v57 = vld [vmem:[%s6463_s8 + $0x2] ss:$0 sm:$0xff] }
  0xef   : > { %v769_v59 = vpop.f32.mrf.mxu0  ;;  %v1095_v61 = vpack.c.bf16 %v596_v58, %v596_v58  ;;  %v1083_v33 = vadd.f32 %v4405_v27, %v596_v58 }
  0xf0   : > { %v1090_v62 = vpack.c.bf16 %v769_v59, %v769_v59  ;;  %v4766_v0 = vpop.f32.mrf.mxu1 }
  0xf1   : > { %v4790_v2 = vpop.f32.mrf.mxu0  ;;  %4853 = vmatmul.mubr.msk.bf16.vlgmr.msra.gmra.mxu1 %vm1128_vm2, %v1095_v61  ;;  %v1087_v38 = vpack.c.bf16 %v1083_v33, %v1083_v33 }
  0xf2   : > { %v1571_v3 = vsel %vm1128_vm2, %v1090_v62, 0  ;;  %4859 = vmatmul.mubr.msk.bf16.vlgmr.msra.gmra.mxu0 %vm1128_vm2, %v1084_v60  ;;  %v599_v4 = vpop.f32.mrf.mxu1  ;;  %4864 = vmatprep.mubr.msk.bf16.mxu1 %vm5377_vm0, %v5376_v1 }
  0xf3   : > { %4869 = vmatpush3.bf16.xpose.msra.mxu0 %v1571_v3  ;;  %4870 = vmatprep.mubr.msk.bf16.mxu0 %vm5377_vm0, %v5376_v1  ;;  %v772_v5 = vpop.f32.mrf.mxu0 }
  0xf4   : > { %4880 = vmatprep.subr.bf16.mxu0 %v5376_v1  ;;  %v4767_v7 = vpop.f32.mrf.mxu1 }
  0xf5   : > { %v4791_v8 = vpop.f32.mrf.mxu0 }
  0xf6   : > { %v717_v9 = vpop.f32.mrf.mxu1 }
  0xf7   : > { %v1089_v11 = vpack.c.bf16 %v717_v9, %v717_v9  ;;  %v4409_v9 = vld [vmem:[%s6463_s8 + $0x3] ss:$0 sm:$0xff] }
  0xf8   : > { %v4782_v13 = vpop.f32.mrf.mxu1  ;;  %v890_v14 = vpop.f32.mrf.mxu0 }
  0xf9   : > { %v1525_v15 = vsel %vm1128_vm2, %v1089_v11, 0  ;;  %v1721_v16 = vpack.c.bf16 %v890_v14, %v890_v14 }
  0xfa   : > { %4871 = vmatmul.mubr.msk.bf16.vlgmr.msra.gmra.mxu0 %vm1128_vm2, %v1086_v10  ;;  %v720_v17 = vpop.f32.mrf.mxu1  ;;  %4863 = vmatpush3.bf16.xpose.msra.mxu1 %v1525_v15  ;;  %v4806_v18 = vpop.f32.mrf.mxu0 }
  0xfb   : > { %4882 = vmatprep.mubr.msk.bf16.mxu0 %vm5377_vm0, %v5376_v1  ;;  %4874 = vmatprep.subr.bf16.mxu1 %v5376_v1  ;;  %v1730_v20 = vsel %vm1728_vm3, %v1721_v16, 0 }
  0xfc   : > { %v4783_v21 = vpop.f32.mrf.mxu1  ;;  %v893_v22 = vpop.f32.mrf.mxu0  ;;  %4881 = vmatpush3.bf16.msra.mxu0 %v1730_v20 }
  0xfd   : > { %4892 = vmatprep.subr.bf16.mxu0 %v5376_v1 }
  0xfe   : > { %v821_v23 = vpop.f32.mrf.mxu1  ;;  %v4807_v24 = vpop.f32.mrf.mxu0 }
  0xff   : > { %v1091_v26 = vpack.c.bf16 %v821_v23, %v821_v23 }
 0x100   : > { %v4798_v28 = vpop.f32.mrf.mxu1  ;;  %v5710_v29 = vpop.f32.mrf.mxu0 }
 0x101   : > { %v1617_v30 = vsel %vm1128_vm2, %v1091_v26, 0  ;;  %4865 = vmatmul.mubr.msk.bf16.vlgmr.msra.gmra.mxu1 %vm1128_vm2, %v1085_v25 }
 0x102   : > { %4875 = vmatpush3.bf16.xpose.msra.mxu1 %v1617_v30  ;;  %4876 = vmatprep.mubr.msk.bf16.mxu1 %vm5377_vm0, %v5376_v1  ;;  %v824_v31 = vpop.f32.mrf.mxu1  ;;  %v4822_v32 = vpop.f32.mrf.mxu0 }
 0x103   : > { %4886 = vmatprep.subr.bf16.mxu1 %v5376_v1 }
 0x104   : > { %v4799_v34 = vpop.f32.mrf.mxu1  ;;  %v997_v35 = vpop.f32.mrf.mxu0 }
 0x106   : > { %v942_v36 = vpop.f32.mrf.mxu1  ;;  %v4823_v37 = vpop.f32.mrf.mxu0 }
 0x107   : > { %v1722_v39 = vpack.c.bf16 %v942_v36, %v942_v36 }
 0x108   : > { %v4814_v40 = vpop.f32.mrf.mxu1 }
 0x109   : > { %4877 = vmatmul.mubr.msk.bf16.vlgmr.msra.gmra.mxu1 %vm1128_vm2, %v1087_v38  ;;  %v1776_v41 = vsel %vm1728_vm3, %v1722_v39, 0 }
 0x10a   : > { %v945_v42 = vpop.f32.mrf.mxu1  ;;  %4887 = vmatpush3.bf16.msra.mxu1 %v1776_v41  ;;  %4888 = vmatprep.mubr.msk.bf16.mxu1 %vm5377_vm0, %v5376_v1 }
 0x10b   : > { %4898 = vmatprep.subr.bf16.mxu1 %v5376_v1 }
 0x10c   : > { %v4815_v43 = vpop.f32.mrf.mxu1 }
 0x10e   : > { %v5722_v44 = vpop.f32.mrf.mxu1 }
 0x110   : > { %v4830_v45 = vpop.f32.mrf.mxu1 }
 0x112   : > { %v1049_v46 = vpop.f32.mrf.mxu1 }
 0x114   : > { %v4831_v47 = vpop.f32.mrf.mxu1 }
 0x115   : > { %v1355_v47 = vlaneseq }
 0x1a1   : > { %v1169_v49 = vpop.f32.mrf.mxu0 }
 0x1a2   : > { %v1170_v50 = vadd.f32 %v4406_v48, %v1169_v49  ;;  %v5768_v48 = vshrl.u32 %v1355_v47, 7 }
 0x1a3   : > { %v4836_v51 = vpop.f32.mrf.mxu0 }
 0x1a4   : > { %v1317_v52 = vrot.slane %v1170_v50, 1  ;;  %v1346_v34 = vsel %vm1128_vm2, %v1170_v50, 0.0  ;;  %v1357_v49 = vsub.s32 7, %v5768_v48 }
 0x1a5   : > { %v1172_v53 = vpop.f32.mrf.mxu0 }
 0x1a6   : > { %v1326_v54 = vsel %vm1325_vm4, %v1317_v52, 0.0  ;;  %v1391_v50 = vand.u32 1, %v1357_v49 }
 0x1a7   : > { %1334 = vrot.lane.b32.xlu0 %v1326_v54, %s5378_s11  ;;  %v4837_v55 = vpop.f32.mrf.mxu0 }
 0x1a8   : > { %vm5771_vm7 = vcmp.ne.s32.totalorder %v1391_v50, 0 }
 0x1a9   : > { %v1215_v58 = vpop.f32.mrf.mxu1  ;;  %v1261_v59 = vpop.f32.mrf.mxu0 }
 0x1aa   : > { %v1216_v60 = vadd.f32 %v4407_v56, %v1215_v58  ;;  %v1262_v61 = vadd.f32 %v4408_v57, %v1261_v59 }
 0x1ab   : > { %v4842_v62 = vpop.f32.mrf.mxu1  ;;  %v4848_v63 = vpop.f32.mrf.mxu0 }
 0x1ac   : > { %v1318_v0 = vrot.slane %v1216_v60, 1  ;;  %v1319_v2 = vrot.slane %v1262_v61, 1  ;;  %v1347_v37 = vsel %vm1128_vm2, %v1216_v60, 0.0  ;;  %v1348_v41 = vsel %vm1128_vm2, %v1262_v61, 0.0 }
 0x1ad   : > { %v1218_v3 = vpop.f32.mrf.mxu1  ;;  %v1264_v4 = vpop.f32.mrf.mxu0 }
 0x1ae   : > { %v1328_v5 = vsel %vm1325_vm4, %v1319_v2, 0.0  ;;  %v1327_v6 = vsel %vm1325_vm4, %v1318_v0, 0.0 }
 0x1af   : > { %1338 = vrot.lane.b32.xlu1 %v1328_v5, %s5378_s11  ;;  %v4849_v7 = vpop.f32.mrf.mxu0  ;;  %1336 = vrot.lane.b32.xlu0 %v1327_v6, %s5378_s11  ;;  %v4843_v8 = vpop.f32.mrf.mxu1  ;;  %v1430_v5 = vand.u32 2, %v1357_v49 }
 0x1b1   : > { %v1307_v10 = vpop.f32.mrf.mxu1  ;;  %vm5795_vm9 = vcmp.ne.s32.totalorder %v1430_v5, 0 }
 0x1b2   : > { %v5742_v11 = vpop.f32.mrf.mxu0  ;;  %v1308_v12 = vadd.f32 %v4409_v9, %v1307_v10 }
 0x1b3   : > { %v4854_v13 = vpop.f32.mrf.mxu1 }
 0x1b4   : > { %v4860_v14 = vpop.f32.mrf.mxu0  ;;  %v1320_v15 = vrot.slane %v1308_v12, 1  ;;  %v1349_v43 = vsel %vm1128_vm2, %v1308_v12, 0.0 }
 0x1b5   : > { %v1310_v16 = vpop.f32.mrf.mxu1 }
 0x1b6   : > { %v1518_v17 = vpop.f32.mrf.mxu0  ;;  %v1329_v18 = vsel %vm1325_vm4, %v1320_v15, 0.0 }
 0x1b7   : > { %1340 = vrot.lane.b32.xlu1 %v1329_v18, %s5378_s11  ;;  %v4855_v20 = vpop.f32.mrf.mxu1 }
 0x1b8   : > { %v4861_v19 = vpop.f32.mrf.mxu0 }
 0x1ba   : > { %v5746_v21 = vpop.f32.mrf.mxu0 }
 0x1bc   : > { %v4872_v22 = vpop.f32.mrf.mxu0 }
 0x1be   : > { %v1610_v23 = vpop.f32.mrf.mxu0 }
 0x1c0   : > { %v4873_v24 = vpop.f32.mrf.mxu0 }
 0x1c1   : > { %v5748_v25 = vpop.f32.mrf.mxu1 }
 0x1c3   : > { %v4866_v26 = vpop.f32.mrf.mxu1 }
 0x1c4   : > { %v1469_v26 = vand.u32 4, %v1357_v49 }
 0x1c5   : > { %v1564_v27 = vpop.f32.mrf.mxu1 }
 0x1c6   : > { %vm5819_vm11 = vcmp.ne.s32.totalorder %v1469_v26, 0 }
 0x1c7   : > { %v4867_v28 = vpop.f32.mrf.mxu1 }
 0x1c9   : > { %v5750_v30 = vpop.f32.mrf.mxu1 }
 0x1cb   : > { %v4878_v31 = vpop.f32.mrf.mxu1 }
 0x1cd   : > { %v1656_v32 = vpop.f32.mrf.mxu1 }
 0x1cf   : > { %v4879_v33 = vpop.f32.mrf.mxu1 }
 0x219   : > { %v1335_v35 = vpop.permute.xlu0 %1334 }
 0x21a   : > { %v1351_v36 = vsel %vm1350_vm5, %v1346_v34, %v1335_v35 }
 0x21b   : > { %1362 = vrot.lane.b32.xlu0 %v1351_v36, %s5379_s29  ;;  %1374 = vrot.lane.b32.xlu1 %v1351_v36, %s6474_s30 }
 0x221   : > { %v1337_v38 = vpop.permute.xlu0 %1336  ;;  %v1339_v40 = vpop.permute.xlu1 %1338 }
 0x222   : > { %v1352_v39 = vsel %vm1350_vm5, %v1347_v37, %v1337_v38  ;;  %v1353_v42 = vsel %vm1350_vm5, %v1348_v41, %v1339_v40 }
 0x223   : > { %1364 = vrot.lane.b32.xlu0 %v1352_v39, %s5379_s29  ;;  %1376 = vrot.lane.b32.xlu1 %v1352_v39, %s6474_s30 }
 0x227   : > { %1366 = vrot.lane.b32.xlu0 %v1353_v42, %s5379_s29  ;;  %1378 = vrot.lane.b32.xlu1 %v1353_v42, %s6474_s30 }
 0x229   : > { %v1341_v45 = vpop.permute.xlu1 %1340 }
 0x22a   : > { %v1354_v46 = vsel %vm1350_vm5, %v1349_v43, %v1341_v45 }
 0x22b   : > { %1380 = vrot.lane.b32.xlu1 %v1354_v46, %s6474_s30  ;;  %1368 = vrot.lane.b32.xlu0 %v1354_v46, %s5379_s29  ;;  %s6487_s30 = smov 15  }
 0x28d   : > { %v1363_v52 = vpop.permute.xlu0 %1362  ;;  %v1375_v53 = vpop.permute.xlu1 %1374 }
 0x28e   : > { %v1387_v54 = vsel %vm1386_vm6, %v1363_v52, %v1375_v53 }
 0x28f   : > { %v1393_v55 = vsel %vm5771_vm7, %v1387_v54, %v1351_v36 }
 0x290   : > { %1413 = vrot.lane.b32.xlu1 %v1393_v55, %s6472_s12  ;;  %1401 = vrot.lane.b32.xlu0 %v1393_v55, %s6466_s20 }
 0x295   : > { %v1365_v56 = vpop.permute.xlu0 %1364  ;;  %v1377_v57 = vpop.permute.xlu1 %1376 }
 0x296   : > { %v1388_v58 = vsel %vm1386_vm6, %v1365_v56, %v1377_v57 }
 0x297   : > { %v1394_v59 = vsel %vm5771_vm7, %v1388_v58, %v1352_v39 }
 0x298   : > { %1415 = vrot.lane.b32.xlu1 %v1394_v59, %s6472_s12  ;;  %1403 = vrot.lane.b32.xlu0 %v1394_v59, %s6466_s20 }
 0x299   : > { %v1367_v60 = vpop.permute.xlu0 %1366  ;;  %v1379_v61 = vpop.permute.xlu1 %1378 }
 0x29a   : > { %v1389_v62 = vsel %vm1386_vm6, %v1367_v60, %v1379_v61 }
 0x29b   : > { %v1395_v63 = vsel %vm5771_vm7, %v1389_v62, %v1353_v42 }
 0x29c   : > { %1417 = vrot.lane.b32.xlu1 %v1395_v63, %s6472_s12  ;;  %1405 = vrot.lane.b32.xlu0 %v1395_v63, %s6466_s20 }
 0x29d   : > { %v1369_v0 = vpop.permute.xlu0 %1368  ;;  %v1381_v2 = vpop.permute.xlu1 %1380 }
 0x29e   : > { %v1390_v3 = vsel %vm1386_vm6, %v1369_v0, %v1381_v2 }
 0x29f   : > { %v1396_v4 = vsel %vm5771_vm7, %v1390_v3, %v1354_v46 }
 0x2a0   : > { %1419 = vrot.lane.b32.xlu1 %v1396_v4, %s6472_s12  ;;  %1407 = vrot.lane.b32.xlu0 %v1396_v4, %s6466_s20  ;;  %s5828_s20 = scalar_lea.vmem %s6456_s1, %s5511_s18  ;;  %s6488_s12 = smov 126  }
 0x2a1   : > { %v4418_v35 = vld [vmem:[%s5828_s20] ss:$0 sm:$0xff] }
 0x302   : > { %v1402_v7 = vpop.permute.xlu0 %1401  ;;  %v1414_v8 = vpop.permute.xlu1 %1413 }
 0x303   : > { %v1426_v9 = vsel %vm1425_vm8, %v1402_v7, %v1414_v8 }
 0x304   : > { %v1432_v10 = vsel %vm5795_vm9, %v1426_v9, %v1393_v55 }
 0x305   : > { %1452 = vrot.lane.b32.xlu1 %v1432_v10, %s6470_s21  ;;  %1440 = vrot.lane.b32.xlu0 %v1432_v10, %s6468_s25 }
 0x30a   : > { %v1404_v12 = vpop.permute.xlu0 %1403  ;;  %v1416_v13 = vpop.permute.xlu1 %1415 }
 0x30b   : > { %v1427_v14 = vsel %vm1425_vm8, %v1404_v12, %v1416_v13 }
 0x30c   : > { %v1433_v15 = vsel %vm5795_vm9, %v1427_v14, %v1394_v59 }
 0x30d   : > { %1454 = vrot.lane.b32.xlu1 %v1433_v15, %s6470_s21  ;;  %1442 = vrot.lane.b32.xlu0 %v1433_v15, %s6468_s25 }
 0x30e   : > { %v1406_v16 = vpop.permute.xlu0 %1405  ;;  %v1418_v17 = vpop.permute.xlu1 %1417 }
 0x30f   : > { %v1428_v18 = vsel %vm1425_vm8, %v1406_v16, %v1418_v17 }
 0x310   : > { %v1434_v19 = vsel %vm5795_vm9, %v1428_v18, %v1395_v63 }
 0x311   : > { %1456 = vrot.lane.b32.xlu1 %v1434_v19, %s6470_s21  ;;  %1444 = vrot.lane.b32.xlu0 %v1434_v19, %s6468_s25 }
 0x312   : > { %v1408_v20 = vpop.permute.xlu0 %1407  ;;  %v1420_v22 = vpop.permute.xlu1 %1419 }
 0x313   : > { %v1429_v23 = vsel %vm1425_vm8, %v1408_v20, %v1420_v22 }
 0x314   : > { %v1435_v24 = vsel %vm5795_vm9, %v1429_v23, %v1396_v4 }
 0x315   : > { %1458 = vrot.lane.b32.xlu1 %v1435_v24, %s6470_s21  ;;  %1446 = vrot.lane.b32.xlu0 %v1435_v24, %s6468_s25  ;;  %s6490_s21 = smov 124  }
 0x377   : > { %v1441_v28 = vpop.permute.xlu0 %1440  ;;  %v1453_v31 = vpop.permute.xlu1 %1452 }
 0x378   : > { %v1465_v32 = vsel %vm1464_vm10, %v1441_v28, %v1453_v31  ;;  %v1723_v28 = vpack.c.bf16 %v5710_v29, %v5710_v29 }
 0x379   : > { %v1471_v33 = vsel %vm5819_vm11, %v1465_v32, %v1432_v10 }
 0x37a   : > { %v1516_v34 = vadd.f32 %v5742_v11, %v1471_v33 }
 0x37c   : > { %v1659_v36 = vmul.f32 0.35355338, %v1516_v34  ;;  %v1822_v34 = vsel %vm1728_vm3, %v1723_v28, 0 }
 0x37e   : > { %v1669_v37 = vadd.f32 %v4418_v35, %v1659_v36  ;;  %v1724_v36 = vpack.c.bf16 %v5722_v44, %v5722_v44 }
 0x37f   : > { %v1443_v38 = vpop.permute.xlu0 %1442  ;;  %v1455_v39 = vpop.permute.xlu1 %1454 }
 0x380   : > { %v1466_v40 = vsel %vm1464_vm10, %v1443_v38, %v1455_v39  ;;  %v1673_v41 = vsel %vm1128_vm2, %v1669_v37, -inf  ;;  %v1868_v39 = vsel %vm1728_vm3, %v1724_v36, 0 }
 0x381   : > { %v1472_v42 = vsel %vm5819_vm11, %v1466_v40, %v1433_v15  ;;  %1674 = vmax.xlane.f32.xlu0 %v1673_v41 }
 0x382   : > { %v1562_v43 = vadd.f32 %v5748_v25, %v1472_v42 }
 0x383   : > { %v1445_v45 = vpop.permute.xlu0 %1444  ;;  %v1457_v46 = vpop.permute.xlu1 %1456 }
 0x384   : > { %v1467_v47 = vsel %vm1464_vm10, %v1445_v45, %v1457_v46  ;;  %v1660_v11 = vmul.f32 0.35355338, %v1562_v43  ;;  %v1914_v45 = vld [vmem:[%s6458_s3] sm:$0xf] }
 0x385   : > { %v1473_v49 = vsel %vm5819_vm11, %v1467_v47, %v1434_v19  ;;  %v1922_v46 = vsel %vm1728_vm3, %v1914_v45, 0  ;;  %v1915_v47 = vld [vmem:[%s6458_s3 + $0x4] sm:$0xf] }
 0x386   : > { %v1670_v50 = vadd.f32 %v4418_v35, %v1660_v11  ;;  %v1608_v52 = vadd.f32 %v5746_v21, %v1473_v49  ;;  %v1968_v11 = vsel %vm1728_vm3, %v1915_v47, 0  ;;  %v1916_v49 = vld [vmem:[%s6458_s3 + $0x8] sm:$0xf] }
 0x387   : > { %v1447_v53 = vpop.permute.xlu0 %1446  ;;  %v1459_v54 = vpop.permute.xlu1 %1458 }
 0x388   : > { %v1468_v55 = vsel %vm1464_vm10, %v1447_v53, %v1459_v54  ;;  %v1676_v56 = vsel %vm1128_vm2, %v1670_v50, -inf  ;;  %v1661_v57 = vmul.f32 0.35355338, %v1608_v52  ;;  %v2014_v53 = vsel %vm1728_vm3, %v1916_v49, 0  ;;  %v5232_v49 = vld [vmem:[%s6459_s4 + $0x8] sm:$0xff]  }
 0x389   : > { %v1474_v25 = vsel %vm5819_vm11, %v1468_v55, %v1435_v24  ;;  %1677 = vmax.xlane.f32.xlu1 %v1676_v56 }
 0x38a   : > { %v1671_v58 = vadd.f32 %v4418_v35, %v1661_v57  ;;  %v1654_v59 = vadd.f32 %v5750_v30, %v1474_v25  ;;  %v1917_v57 = vld [vmem:[%s6458_s3 + $0xc] sm:$0xf] }
 0x38c   : > { %v1679_v60 = vsel %vm1128_vm2, %v1671_v58, -inf  ;;  %v1662_v61 = vmul.f32 0.35355338, %v1654_v59  ;;  %v2060_v59 = vsel %vm1728_vm3, %v1917_v57, 0 }
 0x38d   : > { %1680 = vmax.xlane.f32.xlu0 %v1679_v60 }
 0x38e   : > { %v1672_v62 = vadd.f32 %v4418_v35, %v1662_v61 }
 0x390   : > { %v1682_v21 = vsel %vm1128_vm2, %v1672_v62, -inf }
 0x391   : > { %1683 = vmax.xlane.f32.xlu0 %v1682_v21 }
 0x40a   : > { %v1675_v63 = vpop.xlane.xlu0 %1674 }
 0x40b   : > { %v1685_v0 = vsub.f32 %v1669_v37, %v1675_v63 }
 0x40d   : > { %v1689_v2 = vmul.f32 1.442695, %v1685_v0 }
 0x40f   : > { %5268 = vpow2.f32 %v1689_v2 }
 0x412   : > { %v1678_v3 = vpop.xlane.xlu1 %1677 }
 0x413   : > { %v1686_v4 = vsub.f32 %v1670_v50, %v1678_v3 }
 0x415   : > { %v1691_v5 = vmul.f32 1.442695, %v1686_v4 }
 0x416   : > { %v1681_v7 = vpop.xlane.xlu0 %1680 }
 0x417   : > { %5270 = vpow2.f32 %v1691_v5  ;;  %v1687_v8 = vsub.f32 %v1671_v58, %v1681_v7 }
 0x419   : > { %v1693_v9 = vmul.f32 1.442695, %v1687_v8 }
 0x41a   : > { %v1684_v30 = vpop.xlane.xlu0 %1683 }
 0x41b   : > { %5272 = vpow2.f32 %v1693_v9  ;;  %v1688_v10 = vsub.f32 %v1672_v62, %v1684_v30 }
 0x41c   : > { %v5269_v12 = vpop.eup %5268 }
 0x41d   : > { %v1695_v13 = vmul.f32 1.442695, %v1688_v10  ;;  %v1697_v14 = vsel %vm1128_vm2, %v5269_v12, 0.0 }
 0x41e   : > { %1698 = vadd.xlane.f32.xlu1 %v1697_v14 }
 0x41f   : > { %5274 = vpow2.f32 %v1695_v13 }
 0x424   : > { %v5271_v15 = vpop.eup %5270 }
 0x425   : > { %v1700_v16 = vsel %vm1128_vm2, %v5271_v15, 0.0 }
 0x426   : > { %1701 = vadd.xlane.f32.xlu0 %v1700_v16 }
 0x428   : > { %v5273_v17 = vpop.eup %5272 }
 0x429   : > { %v1703_v18 = vsel %vm1128_vm2, %v5273_v17, 0.0 }
 0x42a   : > { %1704 = vadd.xlane.f32.xlu1 %v1703_v18 }
 0x42c   : > { %v5275_v19 = vpop.eup %5274 }
 0x42d   : > { %v1706_v20 = vsel %vm1128_vm2, %v5275_v19, 0.0 }
 0x42e   : > { %1707 = vadd.xlane.f32.xlu0 %v1706_v20 }
 0x4a7   : > { %v1699_v22 = vpop.xlane.xlu1 %1698 }
 0x4a8   : > { %5276 = vrcp.f32 %v1699_v22 }
 0x4af   : > { %v1702_v23 = vpop.xlane.xlu0 %1701 }
 0x4b0   : > { %5278 = vrcp.f32 %v1702_v23  ;;  %v5913_v23 = vld [vmem:[%s6464_s9] sm:$0x7f] }
 0x4b3   : > { %v1705_v24 = vpop.xlane.xlu1 %1704 }
 0x4b4   : > { %5280 = vrcp.f32 %v1705_v24 }
 0x4b5   : > { %v5277_v26 = vpop.eup %5276 }
 0x4b6   : > { %v1713_v31 = vmul.f32 %v5277_v26, %v5269_v12 }
 0x4b7   : > { %v1708_v32 = vpop.xlane.xlu0 %1707 }
 0x4b8   : > { %5282 = vrcp.f32 %v1708_v32  ;;  %v1717_v33 = vpack.c.bf16 %v1713_v31, %v1713_v31 }
 0x4ba   : > { %4883 = vmatmul.mubr.msk.bf16.vlgmr.msra.gmra.mxu0 %vm1128_vm2, %v1717_v33 }
 0x4bb   : > { %4893 = vmatpush3.bf16.msra.mxu0 %v1822_v34  ;;  %4894 = vmatprep.mubr.msk.bf16.mxu0 %vm5377_vm0, %v5376_v1 }
 0x4bc   : > { %4904 = vmatprep.subr.bf16.mxu0 %v5376_v1 }
 0x4bd   : > { %v5279_v35 = vpop.eup %5278 }
 0x4be   : > { %v1714_v37 = vmul.f32 %v5279_v35, %v5271_v15 }
 0x4c0   : > { %v1718_v29 = vpack.c.bf16 %v1714_v37, %v1714_v37 }
 0x4c1   : > { %v5281_v38 = vpop.eup %5280 }
 0x4c2   : > { %4889 = vmatmul.mubr.msk.bf16.vlgmr.msra.gmra.mxu1 %vm1128_vm2, %v1718_v29  ;;  %v1715_v40 = vmul.f32 %v5281_v38, %v5273_v17 }
 0x4c3   : > { %4899 = vmatpush3.bf16.msra.mxu1 %v1868_v39  ;;  %4900 = vmatprep.mubr.msk.bf16.mxu1 %vm5377_vm0, %v5376_v1 }
 0x4c4   : > { %v1719_v41 = vpack.c.bf16 %v1715_v40, %v1715_v40  ;;  %4910 = vmatprep.subr.bf16.mxu1 %v5376_v1 }
 0x4c5   : > { %v5283_v42 = vpop.eup %5282 }
 0x4c6   : > { %4895 = vmatmul.mubr.msk.bf16.vlgmr.msra.gmra.mxu0 %vm1128_vm2, %v1719_v41  ;;  %v1716_v43 = vmul.f32 %v5283_v42, %v5275_v19  ;;  %v2111_v19 = vsub.s32 0, %v5768_v48  ;;  %v5312_v41 = vld [vmem:[%s5520_s28] sm:$0xff] }
 0x4c7   : > { %4906 = vmatprep.mubr.msk.bf16.mxu0 %vm5377_vm0, %v5376_v1  ;;  %4905 = vmatpush3.bf16.msra.mxu0 %v1922_v46 }
 0x4c8   : > { %v1720_v44 = vpack.c.bf16 %v1716_v43, %v1716_v43  ;;  %4916 = vmatprep.subr.bf16.mxu0 %v5376_v1  ;;  %v2112_v34 = vrot.slane %v5913_v23, %v2111_v19 }
 0x4ca   : > { %4901 = vmatmul.mubr.msk.bf16.vlgmr.msra.gmra.mxu1 %vm1128_vm2, %v1720_v44 }
 0x4cb   : > { %4912 = vmatprep.mubr.msk.bf16.mxu1 %vm5377_vm0, %v5376_v1  ;;  %4911 = vmatpush3.bf16.msra.mxu1 %v1968_v11 }
 0x4cc   : > { %4922 = vmatprep.subr.bf16.mxu1 %v5376_v1 }
 0x57a   : > { %v1766_v50 = vpop.f32.mrf.mxu0 }
 0x57b   : > { %v1910_v52 = vpack.c.bf16 %v1766_v50, %v1766_v50  ;;  %v5233_v50 = vld [vmem:[%s6459_s4] sm:$0xff]  }
 0x57c   : > { %v4884_v54 = vpop.f32.mrf.mxu0 }
 0x57d   : > { %4907 = vmatmul.mubr.msk.bf16.vlgmr.msra.gmra.mxu0 %vm1128_vm2, %v1910_v52 }
 0x57e   : > { %v1769_v55 = vpop.f32.mrf.mxu0  ;;  %4917 = vmatpush3.bf16.msra.mxu0 %v2014_v53  ;;  %4918 = vmatprep.mubr.msk.bf16.mxu0 %vm5377_vm0, %v5376_v1 }
 0x57f   : > { %4928 = vmatprep.subr.bf16.mxu0 %v5376_v1  ;;  %v2131_v55 = vsub.s32 3, %v5768_v48 }
 0x580   : > { %v4885_v56 = vpop.f32.mrf.mxu0 }
 0x581   : > { %v2136_v56 = vsub.s32 4, %v5768_v48  ;;  %v2132_v57 = vrot.slane %v5913_v23, %v2131_v55 }
 0x582   : > { %v1812_v25 = vpop.f32.mrf.mxu1 }
 0x583   : > { %v1911_v58 = vpack.c.bf16 %v1812_v25, %v1812_v25 }
 0x584   : > { %v4890_v60 = vpop.f32.mrf.mxu1 }
 0x585   : > { %4913 = vmatmul.mubr.msk.bf16.vlgmr.msra.gmra.mxu1 %vm1128_vm2, %v1911_v58 }
 0x586   : > { %v1815_v61 = vpop.f32.mrf.mxu1  ;;  %v1858_v62 = vpop.f32.mrf.mxu0  ;;  %4923 = vmatpush3.bf16.msra.mxu1 %v2060_v59  ;;  %4924 = vmatprep.mubr.msk.bf16.mxu1 %vm5377_vm0, %v5376_v1  ;;  %v2137_v59 = vrot.slane %v5913_v23, %v2136_v56 }
 0x587   : > { %v1912_v21 = vpack.c.bf16 %v1858_v62, %v1858_v62  ;;  %4936 = vmatprep.subr.bf16.mxu1 %v5376_v1 }
 0x588   : > { %v4891_v63 = vpop.f32.mrf.mxu1  ;;  %v4896_v0 = vpop.f32.mrf.mxu0 }
 0x589   : > { %4919 = vmatmul.mubr.msk.bf16.vlgmr.msra.gmra.mxu0 %vm1128_vm2, %v1912_v21  ;;  %v5234_v21 = vld [vmem:[%s6460_s5 + $0x18] sm:$0xff]   ;;  %v5235_v63 = vld [vmem:[%s6460_s5 + $0x10] sm:$0xff]   ;;  %v5236_v0 = vld [vmem:[%s6460_s5 + $0x8] sm:$0xff]  }
 0x58a   : > { %v1861_v2 = vpop.f32.mrf.mxu0  ;;  %v1904_v3 = vpop.f32.mrf.mxu1  ;;  %4932 = vmatprep.mubr.msk.bf16.mxu0 %vm5377_vm0, %v5376_v1  ;;  %4929 = vmatpush3.bf16.msra.mxu0 %v5232_v49  ;;  %v2314_v49 = vsub.s32 6, %v5768_v48 }
 0x58b   : > { %v1913_v4 = vpack.c.bf16 %v1904_v3, %v1904_v3  ;;  %4930 = vmatprep.subr.bf16.mxu0 %v5376_v1  ;;  %v5237_v2 = vld [vmem:[%s6460_s5] sm:$0xff]   ;;  %v2146_v3 = vsub.s32 1, %v5768_v48 }
 0x58c   : > { %v4897_v5 = vpop.f32.mrf.mxu0  ;;  %v4902_v7 = vpop.f32.mrf.mxu1 }
 0x58d   : > { %4925 = vmatmul.mubr.msk.bf16.vlgmr.msra.gmra.mxu1 %vm1128_vm2, %v1913_v4  ;;  %v2147_v4 = vrot.slane %v5913_v23, %v2146_v3 }
 0x58e   : > { %v1907_v8 = vpop.f32.mrf.mxu1  ;;  %4944 = vmatprep.mubr.msk.bf16.mxu1 %vm5377_vm0, %v5376_v1  ;;  %4931 = vmatpush3.bf16.msra.mxu0 %v5233_v50 }
 0x58f   : > { %4948 = vmatprep.subr.bf16.mxu0 %v5376_v1  ;;  %4937 = vmatpush3.bf16.msra.mxu1 %v5234_v21  ;;  %v5247_v21 = vld [vmem:[%s6457_s2 + $0xe8] sm:$0xff]  }
 0x590   : > { %v4903_v9 = vpop.f32.mrf.mxu1  ;;  %4938 = vmatprep.subr.bf16.mxu1 %v5376_v1 }
 0x593   : > { %4939 = vmatpush3.bf16.msra.mxu1 %v5235_v63  ;;  %v5248_v63 = vld [vmem:[%s6457_s2 + $0x70] sm:$0xff]  }
 0x594   : > { %4940 = vmatprep.subr.bf16.mxu1 %v5376_v1 }
 0x597   : > { %4941 = vmatpush3.bf16.msra.mxu1 %v5236_v0  ;;  %v5249_v0 = vld [vmem:[%s6457_s2 + $0xe0] sm:$0xff]  }
 0x598   : > { %4942 = vmatprep.subr.bf16.mxu1 %v5376_v1 }
 0x59b   : > { %4943 = vmatpush3.bf16.msra.mxu1 %v5237_v2  ;;  %v5250_v2 = vld [vmem:[%s6457_s2 + $0xd8] sm:$0xff]  }
 0x59c   : > { %4964 = vmatprep.subr.bf16.mxu1 %v5376_v1 }
 0x63d   : > { %v1958_v30 = vpop.f32.mrf.mxu0 }
 0x63e   : > { %v2102_v20 = vsel %vm402_vm1, %v1958_v30, 0.0 }
 0x63f   : > { %v4908_v10 = vpop.f32.mrf.mxu0 }
 0x641   : > { %v1961_v12 = vpop.f32.mrf.mxu0 }
 0x643   : > { %v4909_v13 = vpop.f32.mrf.mxu0 }
 0x645   : > { %v2004_v14 = vpop.f32.mrf.mxu1 }
 0x646   : > { %v2103_v16 = vsel %vm402_vm1, %v2004_v14, 0.0 }
 0x647   : > { %v4914_v15 = vpop.f32.mrf.mxu1  ;;  %v2104_v24 = vadd.f32 %v2103_v16, %v2102_v20 }
 0x649   : > { %v2007_v17 = vpop.f32.mrf.mxu1  ;;  %v2050_v18 = vpop.f32.mrf.mxu0 }
 0x64a   : > { %v2105_v22 = vsel %vm402_vm1, %v2050_v18, 0.0 }
 0x64b   : > { %v4915_v26 = vpop.f32.mrf.mxu1  ;;  %v4920_v28 = vpop.f32.mrf.mxu0  ;;  %v2106_v31 = vadd.f32 %v2105_v22, %v2104_v24  ;;  %v2223_v24 = vsub.s32 2, %v5768_v48 }
 0x64d   : > { %v2053_v32 = vpop.f32.mrf.mxu0  ;;  %v2096_v33 = vpop.f32.mrf.mxu1  ;;  %v2224_v26 = vrot.slane %v5913_v23, %v2223_v24 }
 0x64e   : > { %v2107_v35 = vsel %vm402_vm1, %v2096_v33, 0.0 }
 0x64f   : > { %v2108_v36 = vadd.f32 %v2107_v35, %v2106_v31  ;;  %v4921_v37 = vpop.f32.mrf.mxu0  ;;  %v4926_v29 = vpop.f32.mrf.mxu1 }
 0x651   : > { %v2113_v38 = vadd.f32 %v2112_v34, %v2108_v36  ;;  %v2099_v39 = vpop.f32.mrf.mxu1 }
 0x653   : > { %v4927_v40 = vpop.f32.mrf.mxu1  ;;  %v2114_v42 = vadd.f32 %v5312_v41, %v2113_v38  ;;  %v5238_v41 = vld [vmem:[%s6457_s2 + $0x48] sm:$0xff]  }
 0x655   : > { %v2115_v43 = vsel %vm402_vm1, %v2114_v42, 0.0 }
 0x656   : > { %2116 = vadd.xlane.f32.xlu1 %v2115_v43  ;;  %v5240_v43 = vld [vmem:[%s6457_s2 + $0x40] sm:$0xff]  }
 0x6df   : > { %v2117_v44 = vpop.xlane.xlu1 %2116 }
 0x6e0   : > { %v2119_v45 = vmul.f32 0.03125, %v2117_v44  ;;  %v5241_v44 = vld [vmem:[%s6457_s2 + $0x60] sm:$0xff]  }
 0x6e2   : > { %v2120_v46 = vsub.f32 %v2114_v42, %v2119_v45  ;;  %v5239_v42 = vld [vmem:[%s6457_s2 + $0x68] sm:$0xff]  }
 0x6e4   : > { %v2121_v47 = vmul.f32 %v2120_v46, %v2120_v46 }
 0x6e6   : > { %v2122_v11 = vsel %vm402_vm1, %v2121_v47, 0.0 }
 0x6e7   : > { %2123 = vadd.xlane.f32.xlu0 %v2122_v11  ;;  %v2309_v11 = vsub.s32 5, %v5768_v48 }
 0x6e9   : > { %v2310_v50 = vrot.slane %v5913_v23, %v2309_v11 }
 0x770   : > { %v2124_v52 = vpop.xlane.xlu0 %2123 }
 0x771   : > { %v2125_v53 = vmul.f32 0.03125, %v2124_v52 }
 0x773   : > { %v2126_v54 = vadd.f32 1e-12, %v2125_v53  ;;  %v2315_v53 = vrot.slane %v5913_v23, %v2314_v49  ;;  %v5244_v23 = vld [vmem:[%s6457_s2 + $0x50] sm:$0xff]  }
 0x775   : > { %5284 = vrsqrt.f32 %v2126_v54 }
 0x782   : > { %v5285_v25 = vpop.eup %5284 }
 0x783   : > { %v2128_v58 = vmul.f32 %v5285_v25, %v2120_v46 }
 0x785   : > { %v2133_v60 = vmul.f32 %v2132_v57, %v2128_v58  ;;  %v5242_v58 = vld [vmem:[%s6457_s2 + $0x58] sm:$0xff]  }
 0x787   : > { %v2138_v61 = vadd.f32 %v2137_v59, %v2133_v60  ;;  %v5243_v59 = vld [vmem:[%s6457_s2 + $0xc8] sm:$0xff]  }
 0x789   : > { %v2139_v62 = vpack.c.bf16 %v2138_v61, %v2138_v61 }
 0x78b   : > { %4933 = vmatmul.mubr.msk.bf16.vlgmr.msra.gmra.mxu0 %vm402_vm1, %v2139_v62  ;;  %v5246_v62 = vld [vmem:[%s6457_s2 + $0x78] sm:$0xff]  }
 0x78c   : > { %4952 = vmatprep.mubr.msk.bf16.mxu0 %vm5377_vm0, %v5376_v1  ;;  %4949 = vmatpush3.bf16.msra.mxu0 %v5238_v41 }
 0x78d   : > { %4950 = vmatprep.subr.bf16.mxu0 %v5376_v1 }
 0x790   : > { %4951 = vmatpush3.bf16.msra.mxu0 %v5240_v43 }
 0x791   : > { %4956 = vmatprep.subr.bf16.mxu0 %v5376_v1 }
 0x84b   : > { %v2197_v5 = vpop.f32.mrf.mxu0 }
 0x84c   : > { %v2198_v7 = vadd.f32 %v2197_v5, %v2147_v4  ;;  %v5251_v4 = vld [vmem:[%s6457_s2 + $0x148] sm:$0xff]   ;;  %v5252_v5 = vld [vmem:[%s6457_s2 + $0xd0] sm:$0xff]  }
 0x84d   : > { %v4934_v8 = vpop.f32.mrf.mxu0 }
 0x84e   : > { %v2203_v9 = vmul.f32 %v2198_v7, %v2198_v7  ;;  %v5254_v8 = vld [vmem:[%s6457_s2 + $0xf8] sm:$0xff]  }
 0x84f   : > { %v2200_v30 = vpop.f32.mrf.mxu0 }
 0x850   : > { %v2204_v10 = vmul.f32 %v2203_v9, %v2198_v7  ;;  %v5255_v9 = vld [vmem:[%s6457_s2 + $0x168] sm:$0xff]   ;;  %v5256_v30 = vld [vmem:[%s6457_s2 + $0xf0] sm:$0xff]  }
 0x851   : > { %v4935_v12 = vpop.f32.mrf.mxu0 }
 0x852   : > { %v2205_v13 = vmul.f32 0.044715, %v2204_v10  ;;  %v5257_v10 = vld [vmem:[%s6457_s2 + $0x160] sm:$0xff]   ;;  %v4528_v12 = vld [vmem:[%s6461_s6 + $0x10] sm:$0xf] }
 0x854   : > { %v2206_v14 = vadd.f32 %v2205_v13, %v2198_v7  ;;  %v5258_v13 = vld [vmem:[%s6457_s2 + $0x158] sm:$0xff]  }
 0x856   : > { %v2207_v15 = vmul.f32 0.7978846, %v2206_v14  ;;  %v3081_v14 = vsel %vm1128_vm2, %v4528_v12, 0 }
 0x858   : > { %5286 = vtanh.f32 %v2207_v15  ;;  %v5259_v15 = vld [vmem:[%s6457_s2 + $0x150] sm:$0xff]  }
 0x865   : > { %v5287_v16 = vpop.eup %5286 }
 0x866   : > { %v2209_v17 = vadd.f32 1.0, %v5287_v16  ;;  %v5260_v16 = vld [vmem:[%s6457_s2 + $0x178] sm:$0xff]  }
 0x868   : > { %v2210_v18 = vmul.f32 0.5, %v2209_v17  ;;  %v5261_v17 = vld [vmem:[%s6457_s2 + $0x170] sm:$0xff]  }
 0x86a   : > { %v2211_v20 = vmul.f32 %v2210_v18, %v2198_v7  ;;  %v5253_v7 = vld [vmem:[%s6457_s2 + $0x140] sm:$0xff]   ;;  %v4529_v18 = vld [vmem:[%s6461_s6 + $0x14] sm:$0xf] }
 0x86c   : > { %v2212_v22 = vpack.c.bf16 %v2211_v20, %v2211_v20  ;;  %v3127_v20 = vsel %vm1128_vm2, %v4529_v18, 0 }
 0x86e   : > { %4945 = vmatmul.mubr.msk.bf16.vlgmr.msra.gmra.mxu1 %vm2249_vm12, %v2212_v22  ;;  %v4530_v22 = vld [vmem:[%s6461_s6 + $0x18] sm:$0xf] }
 0x86f   : > { %4968 = vmatprep.mubr.msk.bf16.mxu1 %vm5377_vm0, %v5376_v1  ;;  %4965 = vmatpush3.bf16.msra.mxu1 %v5239_v42 }
 0x870   : > { %4966 = vmatprep.subr.bf16.mxu1 %v5376_v1 }
 0x873   : > { %4967 = vmatpush3.bf16.msra.mxu1 %v5241_v44 }
 0x874   : > { %4980 = vmatprep.subr.bf16.mxu1 %v5376_v1 }
 0x92e   : > { %v2287_v28 = vpop.f32.mrf.mxu1 }
 0x92f   : > { %v2288_v31 = vadd.f32 %v2287_v28, %v2224_v26 }
 0x930   : > { %v4946_v32 = vpop.f32.mrf.mxu1 }
 0x931   : > { %v2293_v33 = vadd.f32 %v2288_v31, %v2138_v61  ;;  %v5245_v61 = vld [vmem:[%s6457_s2 + $0xc0] sm:$0xff]   ;;  %v3173_v32 = vsel %vm1128_vm2, %v4530_v22, 0 }
 0x932   : > { %v2290_v34 = vpop.f32.mrf.mxu1 }
 0x933   : > { %v2294_v35 = vsel %vm402_vm1, %v2293_v33, 0.0 }
 0x934   : > { %2295 = vadd.xlane.f32.xlu1 %v2294_v35  ;;  %v4947_v36 = vpop.f32.mrf.mxu1 }
 0x9bd   : > { %v2296_v37 = vpop.xlane.xlu1 %2295 }
 0x9be   : > { %v2297_v29 = vmul.f32 0.03125, %v2296_v37 }
 0x9c0   : > { %v2298_v38 = vsub.f32 %v2293_v33, %v2297_v29 }
 0x9c2   : > { %v2299_v39 = vmul.f32 %v2298_v38, %v2298_v38 }
 0x9c4   : > { %v2300_v40 = vsel %vm402_vm1, %v2299_v39, 0.0 }
 0x9c5   : > { %2301 = vadd.xlane.f32.xlu0 %v2300_v40 }
 0xa4e   : > { %v2302_v45 = vpop.xlane.xlu0 %2301 }
 0xa4f   : > { %v2303_v46 = vmul.f32 0.03125, %v2302_v45  ;;  %v4524_v45 = vld [vmem:[%s6462_s7 + $0x4] ss:$0 sm:$0xff] }
 0xa51   : > { %v2304_v47 = vadd.f32 1e-12, %v2303_v46 }
 0xa53   : > { %5288 = vrsqrt.f32 %v2304_v47 }
 0xa60   : > { %v5289_v52 = vpop.eup %5288 }
 0xa61   : > { %v2306_v54 = vmul.f32 %v5289_v52, %v2298_v38  ;;  %v4531_v38 = vld [vmem:[%s6461_s6 + $0x1c] sm:$0xf] }
 0xa62   : > { %v3219_v44 = vsel %vm1128_vm2, %v4531_v38, 0 }
 0xa63   : > { %v2311_v57 = vmul.f32 %v2310_v50, %v2306_v54 }
 0xa65   : > { %v5994_v25 = vadd.f32 %v2315_v53, %v2311_v57 }
 0xa67   : > { %v6004_v60 = vpack.c.bf16 %v5994_v25, %v5994_v25 }
 0xa69   : > { %4953 = vmatmul.mubr.msk.bf16.vlgmr.msra.gmra.mxu0 %vm402_vm1, %v6004_v60  ;;  %4969 = vmatmul.mubr.msk.bf16.vlgmr.msra.gmra.mxu1 %vm402_vm1, %v6004_v60 }
 0xa6a   : > { %4957 = vmatpush3.bf16.msra.mxu0 %v5242_v58  ;;  %4981 = vmatpush3.bf16.msra.mxu1 %v5243_v59 }
 0xa6b   : > { %4958 = vmatprep.subr.bf16.mxu0 %v5376_v1  ;;  %4982 = vmatprep.subr.bf16.mxu1 %v5376_v1 }
 0xa6c   : > { %4960 = vmatprep.mubr.msk.bf16.mxu0 %vm5377_vm0, %v5376_v1  ;;  %4984 = vmatprep.mubr.msk.bf16.mxu1 %vm5377_vm0, %v5376_v1 }
 0xa6e   : > { %4959 = vmatpush3.bf16.msra.mxu0 %v5244_v23  ;;  %4983 = vmatpush3.bf16.msra.mxu1 %v5245_v61 }
 0xa6f   : > { %4972 = vmatprep.subr.bf16.mxu0 %v5376_v1  ;;  %4996 = vmatprep.subr.bf16.mxu1 %v5376_v1 }
 0xa71   : > { %4961 = vmatmul.mubr.msk.bf16.vlgmr.msra.gmra.mxu0 %vm402_vm1, %v6004_v60  ;;  %4985 = vmatmul.mubr.msk.bf16.vlgmr.msra.gmra.mxu1 %vm402_vm1, %v6004_v60 }
 0xa72   : > { %4973 = vmatpush3.bf16.msra.mxu0 %v5246_v62  ;;  %4997 = vmatpush3.bf16.msra.mxu1 %v5247_v21  ;;  %v4526_v21 = vld [vmem:[%s6462_s7 + $0x6] ss:$0 sm:$0xff] }
 0xa73   : > { %4974 = vmatprep.subr.bf16.mxu0 %v5376_v1  ;;  %4998 = vmatprep.subr.bf16.mxu1 %v5376_v1 }
 0xa74   : > { %4976 = vmatprep.mubr.msk.bf16.mxu0 %vm5377_vm0, %v5376_v1  ;;  %5000 = vmatprep.mubr.msk.bf16.mxu1 %vm5377_vm0, %v5376_v1 }
 0xa76   : > { %4975 = vmatpush3.bf16.msra.mxu0 %v5248_v63  ;;  %4999 = vmatpush3.bf16.msra.mxu1 %v5249_v0 }
 0xa77   : > { %4988 = vmatprep.subr.bf16.mxu0 %v5376_v1  ;;  %5012 = vmatprep.subr.bf16.mxu1 %v5376_v1 }
 0xa79   : > { %4977 = vmatmul.mubr.msk.bf16.vlgmr.msra.gmra.mxu0 %vm402_vm1, %v6004_v60  ;;  %5001 = vmatmul.mubr.msk.bf16.vlgmr.msra.gmra.mxu1 %vm402_vm1, %v6004_v60 }
 0xa7a   : > { %4989 = vmatpush3.bf16.msra.mxu0 %v5250_v2  ;;  %5013 = vmatpush3.bf16.msra.mxu1 %v5251_v4 }
 0xa7b   : > { %4990 = vmatprep.subr.bf16.mxu0 %v5376_v1  ;;  %5014 = vmatprep.subr.bf16.mxu1 %v5376_v1 }
 0xa7c   : > { %4992 = vmatprep.mubr.msk.bf16.mxu0 %vm5377_vm0, %v5376_v1  ;;  %5016 = vmatprep.mubr.msk.bf16.mxu1 %vm5377_vm0, %v5376_v1 }
 0xa7e   : > { %4991 = vmatpush3.bf16.msra.mxu0 %v5252_v5  ;;  %5015 = vmatpush3.bf16.msra.mxu1 %v5253_v7 }
 0xa7f   : > { %5004 = vmatprep.subr.bf16.mxu0 %v5376_v1  ;;  %5028 = vmatprep.subr.bf16.mxu1 %v5376_v1 }
 0xa81   : > { %4993 = vmatmul.mubr.msk.bf16.vlgmr.msra.gmra.mxu0 %vm402_vm1, %v6004_v60  ;;  %5017 = vmatmul.mubr.msk.bf16.vlgmr.msra.gmra.mxu1 %vm402_vm1, %v6004_v60 }
 0xa82   : > { %5005 = vmatpush3.bf16.msra.mxu0 %v5254_v8  ;;  %5029 = vmatpush3.bf16.msra.mxu1 %v5255_v9 }
 0xa83   : > { %5006 = vmatprep.subr.bf16.mxu0 %v5376_v1  ;;  %5030 = vmatprep.subr.bf16.mxu1 %v5376_v1 }
 0xa84   : > { %5008 = vmatprep.mubr.msk.bf16.mxu0 %vm5377_vm0, %v5376_v1  ;;  %5032 = vmatprep.mubr.msk.bf16.mxu1 %vm5377_vm0, %v5376_v1 }
 0xa86   : > { %5007 = vmatpush3.bf16.msra.mxu0 %v5256_v30  ;;  %5031 = vmatpush3.bf16.msra.mxu1 %v5257_v10 }
 0xa87   : > { %5020 = vmatprep.subr.bf16.mxu0 %v5376_v1  ;;  %5044 = vmatprep.subr.bf16.mxu1 %v5376_v1 }
 0xa89   : > { %5009 = vmatmul.mubr.msk.bf16.vlgmr.msra.gmra.mxu0 %vm402_vm1, %v6004_v60  ;;  %5033 = vmatmul.mubr.msk.bf16.vlgmr.msra.gmra.mxu1 %vm402_vm1, %v6004_v60 }
 0xa8a   : > { %5021 = vmatpush3.bf16.msra.mxu0 %v5258_v13  ;;  %5024 = vmatprep.mubr.msk.bf16.mxu0 %vm5377_vm0, %v5376_v1 }
 0xa8b   : > { %5022 = vmatprep.subr.bf16.mxu0 %v5376_v1  ;;  %5045 = vmatpush3.bf16.xpose.msra.mxu1 %v3081_v14 }
 0xa8c   : > { %5046 = vmatprep.mubr.msk.bf16.mxu1 %vm5377_vm0, %v5376_v1  ;;  %5056 = vmatprep.subr.bf16.mxu1 %v5376_v1 }
 0xa8e   : > { %5023 = vmatpush3.bf16.msra.mxu0 %v5259_v15  ;;  %v4525_v15 = vld [vmem:[%s6462_s7 + $0x5] ss:$0 sm:$0xff] }
 0xa8f   : > { %5036 = vmatprep.subr.bf16.mxu0 %v5376_v1 }
 0xa91   : > { %5025 = vmatmul.mubr.msk.bf16.vlgmr.msra.gmra.mxu0 %vm402_vm1, %v6004_v60 }
 0xa92   : > { %5037 = vmatpush3.bf16.msra.mxu0 %v5260_v16  ;;  %5040 = vmatprep.mubr.msk.bf16.mxu0 %vm5377_vm0, %v5376_v1 }
 0xa93   : > { %5038 = vmatprep.subr.bf16.mxu0 %v5376_v1 }
 0xa96   : > { %5039 = vmatpush3.bf16.msra.mxu0 %v5261_v17 }
 0xa97   : > { %5050 = vmatprep.subr.bf16.mxu0 %v5376_v1 }
 0xa99   : > { %5041 = vmatmul.mubr.msk.bf16.vlgmr.msra.gmra.mxu0 %vm402_vm1, %v6004_v60 }
 0xa9a   : > { %5052 = vmatprep.mubr.msk.bf16.mxu0 %vm5377_vm0, %v5376_v1  ;;  %5051 = vmatpush3.bf16.xpose.msra.mxu0 %v3127_v20 }
 0xa9b   : > { %5062 = vmatprep.subr.bf16.mxu0 %v5376_v1 }
 0xb29   : > { %v2386_v26 = vpop.f32.mrf.mxu0  ;;  %v2490_v28 = vpop.f32.mrf.mxu1 }
 0xb2a   : > { %v3039_v31 = vpack.c.bf16 %v2386_v26, %v2386_v26  ;;  %v3041_v41 = vpack.c.bf16 %v2490_v28, %v2490_v28  ;;  %v3027_v54 = vadd.f32 %v4524_v45, %v2386_v26  ;;  %v3029_v7 = vadd.f32 %v4526_v21, %v2490_v28 }
 0xb2b   : > { %v4954_v33 = vpop.f32.mrf.mxu0  ;;  %v4970_v34 = vpop.f32.mrf.mxu1 }
 0xb2c   : > { %5047 = vmatmul.mubr.msk.bf16.vlgmr.msra.gmra.mxu1 %vm1128_vm2, %v3039_v31  ;;  %v3031_v23 = vpack.c.bf16 %v3027_v54, %v3027_v54  ;;  %v3033_v12 = vpack.c.bf16 %v3029_v7, %v3029_v7  ;;  %v4538_v7 = vld [vmem:[%s6463_s8 + $0x6] ss:$0 sm:$0xff] }
 0xb2d   : > { %v2389_v35 = vpop.f32.mrf.mxu0  ;;  %v2493_v36 = vpop.f32.mrf.mxu1  ;;  %5057 = vmatpush3.bf16.xpose.msra.mxu1 %v3173_v32  ;;  %5058 = vmatprep.mubr.msk.bf16.mxu1 %vm5377_vm0, %v5376_v1 }
 0xb2e   : > { %5068 = vmatprep.subr.bf16.mxu1 %v5376_v1 }
 0xb2f   : > { %v4955_v37 = vpop.f32.mrf.mxu0  ;;  %v4971_v29 = vpop.f32.mrf.mxu1 }
 0xb30   : > { %v4527_v37 = vld [vmem:[%s6462_s7 + $0x7] ss:$0 sm:$0xff] }
 0xb31   : > { %v2438_v39 = vpop.f32.mrf.mxu0  ;;  %v2611_v40 = vpop.f32.mrf.mxu1 }
 0xb32   : > { %v3040_v42 = vpack.c.bf16 %v2438_v39, %v2438_v39  ;;  %v3035_v43 = vpack.c.bf16 %v2611_v40, %v2611_v40  ;;  %v3028_v28 = vadd.f32 %v4525_v15, %v2438_v39 }
 0xb33   : > { %v4962_v46 = vpop.f32.mrf.mxu0  ;;  %v4986_v47 = vpop.f32.mrf.mxu1 }
 0xb34   : > { %v3413_v50 = vsel %vm1128_vm2, %v3035_v43, 0  ;;  %5053 = vmatmul.mubr.msk.bf16.vlgmr.msra.gmra.mxu0 %vm1128_vm2, %v3040_v42  ;;  %5059 = vmatmul.mubr.msk.bf16.vlgmr.msra.gmra.mxu1 %vm1128_vm2, %v3041_v41  ;;  %v3032_v35 = vpack.c.bf16 %v3028_v28, %v3028_v28  ;;  %v4539_v28 = vld [vmem:[%s6463_s8 + $0x7] ss:$0 sm:$0xff] }
 0xb35   : > { %v2441_v52 = vpop.f32.mrf.mxu0  ;;  %v2614_v53 = vpop.f32.mrf.mxu1  ;;  %5063 = vmatpush3.bf16.xpose.msra.mxu0 %v3219_v44  ;;  %5069 = vmatpush3.bf16.xpose.msra.mxu1 %v3413_v50 }
 0xb36   : > { %5064 = vmatprep.mubr.msk.bf16.mxu0 %vm5377_vm0, %v5376_v1  ;;  %5070 = vmatprep.mubr.msk.bf16.mxu1 %vm5377_vm0, %v5376_v1 }
 0xb37   : > { %v4963_v57 = vpop.f32.mrf.mxu0  ;;  %v4987_v58 = vpop.f32.mrf.mxu1  ;;  %5080 = vmatprep.subr.bf16.mxu1 %v5376_v1  ;;  %5074 = vmatprep.subr.bf16.mxu0 %v5376_v1 }
 0xb39   : > { %v2542_v59 = vpop.f32.mrf.mxu0  ;;  %v2715_v60 = vpop.f32.mrf.mxu1 }
 0xb3a   : > { %v3042_v61 = vpack.c.bf16 %v2542_v59, %v2542_v59  ;;  %v3037_v62 = vpack.c.bf16 %v2715_v60, %v2715_v60  ;;  %v3030_v42 = vadd.f32 %v4527_v37, %v2542_v59 }
 0xb3b   : > { %v4978_v63 = vpop.f32.mrf.mxu0  ;;  %v5002_v0 = vpop.f32.mrf.mxu1 }
 0xb3c   : > { %v3505_v2 = vsel %vm1128_vm2, %v3037_v62, 0  ;;  %5065 = vmatmul.mubr.msk.bf16.vlgmr.msra.gmra.mxu0 %vm1128_vm2, %v3042_v61  ;;  %5071 = vmatmul.mubr.msk.bf16.vlgmr.msra.gmra.mxu1 %vm1128_vm2, %v3031_v23  ;;  %v3034_v46 = vpack.c.bf16 %v3030_v42, %v3030_v42  ;;  %v4536_v23 = vld [vmem:[%s6463_s8 + $0x4] ss:$0 sm:$0xff] }
 0xb3d   : > { %v2545_v4 = vpop.f32.mrf.mxu0  ;;  %v2718_v5 = vpop.f32.mrf.mxu1  ;;  %5081 = vmatpush3.bf16.xpose.msra.mxu1 %v3505_v2  ;;  %5082 = vmatprep.mubr.msk.bf16.mxu1 %vm5377_vm0, %v5376_v1 }
 0xb3e   : > { %5092 = vmatprep.subr.bf16.mxu1 %v5376_v1  ;;  %5076 = vmatprep.mubr.msk.bf16.mxu0 %vm5377_vm0, %v5376_v1  ;;  %v4537_v5 = vld [vmem:[%s6463_s8 + $0x5] ss:$0 sm:$0xff] }
 0xb3f   : > { %v4979_v8 = vpop.f32.mrf.mxu0  ;;  %v5003_v9 = vpop.f32.mrf.mxu1 }
 0xb41   : > { %v2663_v30 = vpop.f32.mrf.mxu0  ;;  %v2836_v10 = vpop.f32.mrf.mxu1 }
 0xb42   : > { %v3036_v13 = vpack.c.bf16 %v2663_v30, %v2663_v30  ;;  %v3649_v14 = vpack.c.bf16 %v2836_v10, %v2836_v10 }
 0xb43   : > { %v4994_v16 = vpop.f32.mrf.mxu0  ;;  %v5018_v17 = vpop.f32.mrf.mxu1 }
 0xb44   : > { %v3459_v18 = vsel %vm1128_vm2, %v3036_v13, 0  ;;  %v3657_v20 = vsel %vm1728_vm3, %v3649_v14, 0  ;;  %5083 = vmatmul.mubr.msk.bf16.vlgmr.msra.gmra.mxu1 %vm1128_vm2, %v3033_v12 }
 0xb45   : > { %v2666_v22 = vpop.f32.mrf.mxu0  ;;  %v2839_v26 = vpop.f32.mrf.mxu1  ;;  %5075 = vmatpush3.bf16.xpose.msra.mxu0 %v3459_v18  ;;  %5093 = vmatpush3.bf16.msra.mxu1 %v3657_v20 }
 0xb46   : > { %5086 = vmatprep.subr.bf16.mxu0 %v5376_v1  ;;  %5094 = vmatprep.mubr.msk.bf16.mxu1 %vm5377_vm0, %v5376_v1 }
 0xb47   : > { %v4995_v31 = vpop.f32.mrf.mxu0  ;;  %v5019_v32 = vpop.f32.mrf.mxu1  ;;  %5104 = vmatprep.subr.bf16.mxu1 %v5376_v1 }
 0xb49   : > { %v2767_v33 = vpop.f32.mrf.mxu0  ;;  %v6183_v34 = vpop.f32.mrf.mxu1 }
 0xb4a   : > { %v3038_v36 = vpack.c.bf16 %v2767_v33, %v2767_v33 }
 0xb4b   : > { %v5010_v29 = vpop.f32.mrf.mxu0  ;;  %v5034_v38 = vpop.f32.mrf.mxu1 }
 0xb4c   : > { %v3551_v39 = vsel %vm1128_vm2, %v3038_v36, 0  ;;  %5077 = vmatmul.mubr.msk.bf16.vlgmr.msra.gmra.mxu0 %vm1128_vm2, %v3032_v35 }
 0xb4d   : > { %v2770_v40 = vpop.f32.mrf.mxu0  ;;  %v2943_v41 = vpop.f32.mrf.mxu1  ;;  %5087 = vmatpush3.bf16.xpose.msra.mxu0 %v3551_v39  ;;  %5088 = vmatprep.mubr.msk.bf16.mxu0 %vm5377_vm0, %v5376_v1 }
 0xb4e   : > { %5098 = vmatprep.subr.bf16.mxu0 %v5376_v1 }
 0xb4f   : > { %v5011_v43 = vpop.f32.mrf.mxu0  ;;  %v5035_v44 = vpop.f32.mrf.mxu1 }
 0xb51   : > { %v2888_v45 = vpop.f32.mrf.mxu0 }
 0xb52   : > { %v3650_v47 = vpack.c.bf16 %v2888_v45, %v2888_v45 }
 0xb53   : > { %v5026_v50 = vpop.f32.mrf.mxu0 }
 0xb54   : > { %v3703_v52 = vsel %vm1728_vm3, %v3650_v47, 0  ;;  %5089 = vmatmul.mubr.msk.bf16.vlgmr.msra.gmra.mxu0 %vm1128_vm2, %v3034_v46 }
 0xb55   : > { %v2891_v53 = vpop.f32.mrf.mxu0  ;;  %5099 = vmatpush3.bf16.msra.mxu0 %v3703_v52  ;;  %5100 = vmatprep.mubr.msk.bf16.mxu0 %vm5377_vm0, %v5376_v1 }
 0xb56   : > { %5110 = vmatprep.subr.bf16.mxu0 %v5376_v1 }
 0xb57   : > { %v5027_v54 = vpop.f32.mrf.mxu0 }
 0xb59   : > { %v6198_v57 = vpop.f32.mrf.mxu0 }
 0xb5b   : > { %v5042_v58 = vpop.f32.mrf.mxu0 }
 0xb5d   : > { %v2995_v59 = vpop.f32.mrf.mxu0 }
 0xb5f   : > { %v5043_v60 = vpop.f32.mrf.mxu0 }
 0xbec   : > { %v3117_v61 = vpop.f32.mrf.mxu1 }
 0xbed   : > { %v3118_v62 = vadd.f32 %v4536_v23, %v3117_v61 }
 0xbee   : > { %v5048_v21 = vpop.f32.mrf.mxu1 }
 0xbef   : > { %v3265_v63 = vrot.slane %v3118_v62, 1  ;;  %v3293_v60 = vsel %vm1128_vm2, %v3118_v62, 0.0 }
 0xbf0   : > { %v3120_v0 = vpop.f32.mrf.mxu1 }
 0xbf1   : > { %v3273_v2 = vsel %vm1325_vm4, %v3265_v63, 0.0 }
 0xbf2   : > { %3281 = vrot.lane.b32.xlu1 %v3273_v2, %s5378_s11  ;;  %v5049_v4 = vpop.f32.mrf.mxu1 }
 0xbf4   : > { %v3163_v8 = vpop.f32.mrf.mxu0  ;;  %v3209_v9 = vpop.f32.mrf.mxu1 }
 0xbf5   : > { %v3164_v30 = vadd.f32 %v4537_v5, %v3163_v8  ;;  %v3210_v10 = vadd.f32 %v4538_v7, %v3209_v9 }
 0xbf6   : > { %v5054_v12 = vpop.f32.mrf.mxu0  ;;  %v5060_v13 = vpop.f32.mrf.mxu1 }
 0xbf7   : > { %v3266_v14 = vrot.slane %v3164_v30, 1  ;;  %v3267_v15 = vrot.slane %v3210_v10, 1  ;;  %v3294_v21 = vsel %vm1128_vm2, %v3164_v30, 0.0  ;;  %v3295_v4 = vsel %vm1128_vm2, %v3210_v10, 0.0 }
 0xbf8   : > { %v3166_v16 = vpop.f32.mrf.mxu0  ;;  %v3212_v17 = vpop.f32.mrf.mxu1 }
 0xbf9   : > { %v3274_v18 = vsel %vm1325_vm4, %v3266_v14, 0.0  ;;  %v3275_v20 = vsel %vm1325_vm4, %v3267_v15, 0.0 }
 0xbfa   : > { %3283 = vrot.lane.b32.xlu0 %v3274_v18, %s5378_s11  ;;  %v5055_v22 = vpop.f32.mrf.mxu0  ;;  %3285 = vrot.lane.b32.xlu1 %v3275_v20, %s5378_s11  ;;  %v5061_v26 = vpop.f32.mrf.mxu1 }
 0xbfc   : > { %v3255_v31 = vpop.f32.mrf.mxu0  ;;  %v6218_v32 = vpop.f32.mrf.mxu1 }
 0xbfd   : > { %v3256_v33 = vadd.f32 %v4539_v28, %v3255_v31 }
 0xbfe   : > { %v5066_v35 = vpop.f32.mrf.mxu0  ;;  %v5072_v36 = vpop.f32.mrf.mxu1 }
 0xbff   : > { %v3268_v37 = vrot.slane %v3256_v33, 1  ;;  %v3296_v5 = vsel %vm1128_vm2, %v3256_v33, 0.0 }
 0xc00   : > { %v3258_v29 = vpop.f32.mrf.mxu0  ;;  %v3452_v38 = vpop.f32.mrf.mxu1 }
 0xc01   : > { %v3276_v39 = vsel %vm1325_vm4, %v3268_v37, 0.0 }
 0xc02   : > { %v5067_v40 = vpop.f32.mrf.mxu0  ;;  %3287 = vrot.lane.b32.xlu1 %v3276_v39, %s5378_s11  ;;  %v5073_v41 = vpop.f32.mrf.mxu1  ;;  %s6486_s11 = smov 16  }
 0xc04   : > { %v6222_v42 = vpop.f32.mrf.mxu1 }
 0xc06   : > { %v5084_v43 = vpop.f32.mrf.mxu1 }
 0xc08   : > { %v3544_v44 = vpop.f32.mrf.mxu1 }
 0xc0a   : > { %v5085_v45 = vpop.f32.mrf.mxu1 }
 0xc0c   : > { %v6224_v46 = vpop.f32.mrf.mxu0 }
 0xc0e   : > { %v5078_v47 = vpop.f32.mrf.mxu0 }
 0xc10   : > { %v3498_v50 = vpop.f32.mrf.mxu0 }
 0xc12   : > { %v5079_v52 = vpop.f32.mrf.mxu0 }
 0xc14   : > { %v6226_v53 = vpop.f32.mrf.mxu0 }
 0xc16   : > { %v5090_v54 = vpop.f32.mrf.mxu0 }
 0xc18   : > { %v3590_v58 = vpop.f32.mrf.mxu0 }
 0xc1a   : > { %v5091_v59 = vpop.f32.mrf.mxu0 }
 0xc64   : > { %v3282_v23 = vpop.permute.xlu1 %3281 }
 0xc65   : > { %v3297_v61 = vsel %vm1350_vm5, %v3293_v60, %v3282_v23 }
 0xc66   : > { %3305 = vrot.lane.b32.xlu0 %v3297_v61, %s5379_s29  ;;  %3317 = vrot.lane.b32.xlu1 %v3297_v61, %s6486_s11 }
 0xc6c   : > { %v3284_v63 = vpop.permute.xlu0 %3283  ;;  %v3286_v2 = vpop.permute.xlu1 %3285 }
 0xc6d   : > { %v3298_v0 = vsel %vm1350_vm5, %v3294_v21, %v3284_v63  ;;  %v3299_v62 = vsel %vm1350_vm5, %v3295_v4, %v3286_v2  ;;  %v5313_v63 = vld [vmem:[%s5828_s20] ss:$0 sm:$0xff]  ;;  %s359_s20 = sand.u32 1, %s5366_s14  }
 0xc6e   : > { %3307 = vrot.lane.b32.xlu0 %v3298_v0, %s5379_s29  ;;  %3319 = vrot.lane.b32.xlu1 %v3298_v0, %s6486_s11  ;;  %s4332_s26 = sshll.u32 %s359_s20, 3 }
 0xc6f   : > { %s361_s25 = scalar_lea.vmem [#allocation2], %s4332_s26 }
 0xc70   : > { %s4260_s18 = sshll.u32 %s361_s25, 4  ;;  %s4261_s18 = int_to_ptr.vmem [resolvable:$true] %s4260_s18 }
 0xc72   : > { %3321 = vrot.lane.b32.xlu1 %v3299_v62, %s6486_s11  ;;  %3309 = vrot.lane.b32.xlu0 %v3299_v62, %s5379_s29 }
 0xc74   : > { %v3288_v7 = vpop.permute.xlu1 %3287 }
 0xc75   : > { %v3300_v8 = vsel %vm1350_vm5, %v3296_v5, %v3288_v7 }
 0xc76   : > { %3323 = vrot.lane.b32.xlu1 %v3300_v8, %s6486_s11  ;;  %3311 = vrot.lane.b32.xlu0 %v3300_v8, %s5379_s29  ;;  %s6489_s29 = smov 13  }
 0xcd8   : > { %v3306_v9 = vpop.permute.xlu0 %3305  ;;  %v3318_v30 = vpop.permute.xlu1 %3317 }
 0xcd9   : > { %v3329_v12 = vsel %vm1386_vm6, %v3306_v9, %v3318_v30 }
 0xcda   : > { %v3333_v10 = vsel %vm5771_vm7, %v3329_v12, %v3297_v61 }
 0xcdb   : > { %3353 = vrot.lane.b32.xlu1 %v3333_v10, %s6487_s30  ;;  %3341 = vrot.lane.b32.xlu0 %v3333_v10, %s6488_s12 }
 0xce0   : > { %v3308_v13 = vpop.permute.xlu0 %3307  ;;  %v3320_v14 = vpop.permute.xlu1 %3319 }
 0xce1   : > { %v3330_v15 = vsel %vm1386_vm6, %v3308_v13, %v3320_v14 }
 0xce2   : > { %v3334_v16 = vsel %vm5771_vm7, %v3330_v15, %v3298_v0 }
 0xce3   : > { %3355 = vrot.lane.b32.xlu1 %v3334_v16, %s6487_s30  ;;  %3343 = vrot.lane.b32.xlu0 %v3334_v16, %s6488_s12 }
 0xce4   : > { %v3310_v17 = vpop.permute.xlu0 %3309  ;;  %v3322_v18 = vpop.permute.xlu1 %3321 }
 0xce5   : > { %v3331_v20 = vsel %vm1386_vm6, %v3310_v17, %v3322_v18 }
 0xce6   : > { %v3335_v22 = vsel %vm5771_vm7, %v3331_v20, %v3299_v62 }
 0xce7   : > { %3357 = vrot.lane.b32.xlu1 %v3335_v22, %s6487_s30  ;;  %3345 = vrot.lane.b32.xlu0 %v3335_v22, %s6488_s12 }
 0xce8   : > { %v3312_v26 = vpop.permute.xlu0 %3311  ;;  %v3324_v28 = vpop.permute.xlu1 %3323 }
 0xce9   : > { %v3332_v31 = vsel %vm1386_vm6, %v3312_v26, %v3324_v28 }
 0xcea   : > { %v3336_v33 = vsel %vm5771_vm7, %v3332_v31, %v3300_v8 }
 0xceb   : > { %3359 = vrot.lane.b32.xlu1 %v3336_v33, %s6487_s30  ;;  %3347 = vrot.lane.b32.xlu0 %v3336_v33, %s6488_s12  ;;  %s4258_s30 = scalar_lea.hbm %s6465_s10, %s4581_s27  ;;  %s4247_s12 = scalar_lea.sflag [#allocation3], %s359_s20 }
 0xd4d   : > { %v3342_v35 = vpop.permute.xlu0 %3341  ;;  %v3354_v36 = vpop.permute.xlu1 %3353 }
 0xd4e   : > { %v3365_v37 = vsel %vm1425_vm8, %v3342_v35, %v3354_v36 }
 0xd4f   : > { %v3369_v29 = vsel %vm5795_vm9, %v3365_v37, %v3333_v10 }
 0xd50   : > { %3389 = vrot.lane.b32.xlu1 %v3369_v29, %s6489_s29  ;;  %3377 = vrot.lane.b32.xlu0 %v3369_v29, %s6490_s21 }
 0xd55   : > { %v3344_v38 = vpop.permute.xlu0 %3343  ;;  %v3356_v39 = vpop.permute.xlu1 %3355 }
 0xd56   : > { %v3366_v51 = vsel %vm1425_vm8, %v3344_v38, %v3356_v39 }
 0xd57   : > { %v3370_v40 = vsel %vm5795_vm9, %v3366_v51, %v3334_v16 }
 0xd58   : > { %3391 = vrot.lane.b32.xlu1 %v3370_v40, %s6489_s29  ;;  %3379 = vrot.lane.b32.xlu0 %v3370_v40, %s6490_s21 }
 0xd59   : > { %v3346_v41 = vpop.permute.xlu0 %3345  ;;  %v3358_v43 = vpop.permute.xlu1 %3357 }
 0xd5a   : > { %v3367_v44 = vsel %vm1425_vm8, %v3346_v41, %v3358_v43 }
 0xd5b   : > { %v3371_v45 = vsel %vm5795_vm9, %v3367_v44, %v3335_v22 }
 0xd5c   : > { %3393 = vrot.lane.b32.xlu1 %v3371_v45, %s6489_s29  ;;  %3381 = vrot.lane.b32.xlu0 %v3371_v45, %s6490_s21 }
 0xd5d   : > { %v3348_v47 = vpop.permute.xlu0 %3347  ;;  %v3360_v50 = vpop.permute.xlu1 %3359 }
 0xd5e   : > { %v3368_v52 = vsel %vm1425_vm8, %v3348_v47, %v3360_v50 }
 0xd5f   : > { %v3372_v54 = vsel %vm5795_vm9, %v3368_v52, %v3336_v33 }
 0xd60   : > { %3395 = vrot.lane.b32.xlu1 %v3372_v54, %s6489_s29  ;;  %3383 = vrot.lane.b32.xlu0 %v3372_v54, %s6490_s21  ;;  %s5314_s29 = scalar_lea.vmem %s4261_s18, 128  ;;  %s5385_s21 = smov [#allocation2]  }
 0xd61   : > { %p5315_p11 = scmp.ne.s32.totalorder %s4261_s18, %s5314_s29  ;;  %s5318_s0 = sshll.u32 %s5385_s21, 4  ;;  %s5319_s0 = int_to_ptr.vmem [resolvable:$false] %s5318_s0 }
 0xd62   : > { %s5320_s17 = scalar_lea.vmem %s5319_s0, 256  ;;  %p5321_p0 = scmp.lt.s32.totalorder %s4261_s18, %s5319_s0 }
 0xd63   : > { %p5316_p12 = pnand %p5315_p11, %p5479_p5  ;;  %p5322_p1 = scmp.lt.s32.totalorder %s5320_s17, %s5314_s29 }
 0xd65   : > { %p5317_p13 = pneg %p5316_p12  ;;  %p5323_p2 = por %p5322_p1, %p5321_p0 }
 0xd67   : > { %p5324_p3 = pnand %p5323_p2, %p5317_p13 }
 0xdc2   : > { %v3378_v58 = vpop.permute.xlu0 %3377  ;;  %v3390_v59 = vpop.permute.xlu1 %3389 }
 0xdc3   : > { %v3401_v60 = vsel %vm1464_vm10, %v3378_v58, %v3390_v59 }
 0xdc4   : > { %v3405_v23 = vsel %vm5819_vm11, %v3401_v60, %v3369_v29 }
 0xdc5   : > { %v3450_v61 = vadd.f32 %v6218_v32, %v3405_v23 }
 0xdc7   : > { %v3593_v21 = vmul.f32 0.35355338, %v3450_v61 }
 0xdc9   : > { %v3597_v0 = vadd.f32 %v5313_v63, %v3593_v21  ;;  %v3651_v21 = vpack.c.bf16 %v6183_v34, %v6183_v34 }
 0xdca   : > { %v3380_v2 = vpop.permute.xlu0 %3379  ;;  %v3392_v4 = vpop.permute.xlu1 %3391 }
 0xdcb   : > { %v3402_v6 = vsel %vm1464_vm10, %v3380_v2, %v3392_v4  ;;  %v3601_v62 = vsel %vm1128_vm2, %v3597_v0, -inf  ;;  %v3749_v4 = vsel %vm1728_vm3, %v3651_v21, 0 }
 0xdcc   : > { %v3406_v5 = vsel %vm5819_vm11, %v3402_v6, %v3370_v40  ;;  %3602 = vmax.xlane.f32.xlu0 %v3601_v62  ;;  %v3652_v62 = vpack.c.bf16 %v6198_v57, %v6198_v57 }
 0xdcd   : > { %v3496_v7 = vadd.f32 %v6224_v46, %v3406_v5 }
 0xdce   : > { %v3382_v8 = vpop.permute.xlu0 %3381  ;;  %v3394_v9 = vpop.permute.xlu1 %3393 }
 0xdcf   : > { %v3403_v30 = vsel %vm1464_vm10, %v3382_v8, %v3394_v9  ;;  %v3594_v32 = vmul.f32 0.35355338, %v3496_v7  ;;  %v3795_v8 = vsel %vm1728_vm3, %v3652_v62, 0 }
 0xdd0   : > { %v3407_v12 = vsel %vm5819_vm11, %v3403_v30, %v3371_v45 }
 0xdd1   : > { %v3598_v10 = vadd.f32 %v5313_v63, %v3594_v32  ;;  %v3542_v13 = vadd.f32 %v6222_v42, %v3407_v12 }
 0xdd2   : > { %v3384_v14 = vpop.permute.xlu0 %3383  ;;  %v3396_v15 = vpop.permute.xlu1 %3395 }
 0xdd3   : > { %v3404_v16 = vsel %vm1464_vm10, %v3384_v14, %v3396_v15  ;;  %v3604_v17 = vsel %vm1128_vm2, %v3598_v10, -inf  ;;  %v3595_v18 = vmul.f32 0.35355338, %v3542_v13  ;;  %v4553_v14 = vld [vmem:[%s6458_s3 + $0x14] sm:$0xf] }
 0xdd4   : > { %v3408_v46 = vsel %vm5819_vm11, %v3404_v16, %v3372_v54  ;;  %3605 = vmax.xlane.f32.xlu1 %v3604_v17  ;;  %v3896_v15 = vsel %vm1728_vm3, %v4553_v14, 0  ;;  %v4554_v16 = vld [vmem:[%s6458_s3 + $0x18] sm:$0xf] }
 0xdd5   : > { %v3599_v20 = vadd.f32 %v5313_v63, %v3595_v18  ;;  %v3588_v22 = vadd.f32 %v6226_v53, %v3408_v46  ;;  %v3942_v46 = vsel %vm1728_vm3, %v4554_v16, 0 }
 0xdd7   : > { %v3607_v26 = vsel %vm1128_vm2, %v3599_v20, -inf  ;;  %v3596_v28 = vmul.f32 0.35355338, %v3588_v22 }
 0xdd8   : > { %3608 = vmax.xlane.f32.xlu0 %v3607_v26 }
 0xdd9   : > { %v3600_v31 = vadd.f32 %v5313_v63, %v3596_v28  ;;  %v4555_v28 = vld [vmem:[%s6458_s3 + $0x1c] sm:$0xf] }
 0xddb   : > { %v3610_v42 = vsel %vm1128_vm2, %v3600_v31, -inf }
 0xddc   : > { %3611 = vmax.xlane.f32.xlu0 %v3610_v42 }
 0xe55   : > { %v3603_v33 = vpop.xlane.xlu0 %3602 }
 0xe56   : > { %v3613_v35 = vsub.f32 %v3597_v0, %v3603_v33  ;;  %v3988_v33 = vsel %vm1728_vm3, %v4555_v28, 0 }
 0xe58   : > { %v3617_v36 = vmul.f32 1.442695, %v3613_v35 }
 0xe5a   : > { %5290 = vpow2.f32 %v3617_v36 }
 0xe5d   : > { %v3606_v37 = vpop.xlane.xlu1 %3605 }
 0xe5e   : > { %v3614_v29 = vsub.f32 %v3598_v10, %v3606_v37  ;;  %v4552_v10 = vld [vmem:[%s6458_s3 + $0x10] sm:$0xf] }
 0xe5f   : > { %v3850_v13 = vsel %vm1728_vm3, %v4552_v10, 0 }
 0xe60   : > { %v3619_v27 = vmul.f32 1.442695, %v3614_v29 }
 0xe61   : > { %v3609_v38 = vpop.xlane.xlu0 %3608 }
 0xe62   : > { %5292 = vpow2.f32 %v3619_v27  ;;  %v3615_v39 = vsub.f32 %v3599_v20, %v3609_v38 }
 0xe64   : > { %v3621_v51 = vmul.f32 1.442695, %v3615_v39 }
 0xe65   : > { %v3612_v53 = vpop.xlane.xlu0 %3611 }
 0xe66   : > { %5294 = vpow2.f32 %v3621_v51  ;;  %v3616_v40 = vsub.f32 %v3600_v31, %v3612_v53 }
 0xe67   : > { %v5291_v41 = vpop.eup %5290 }
 0xe68   : > { %v3623_v43 = vmul.f32 1.442695, %v3616_v40  ;;  %v3625_v44 = vsel %vm1128_vm2, %v5291_v41, 0.0 }
 0xe69   : > { %3626 = vadd.xlane.f32.xlu1 %v3625_v44 }
 0xe6a   : > { %5296 = vpow2.f32 %v3623_v43 }
 0xe6f   : > { %v5293_v45 = vpop.eup %5292 }
 0xe70   : > { %v3628_v47 = vsel %vm1128_vm2, %v5293_v45, 0.0 }
 0xe71   : > { %3629 = vadd.xlane.f32.xlu0 %v3628_v47 }
 0xe73   : > { %v5295_v50 = vpop.eup %5294 }
 0xe74   : > { %v3631_v52 = vsel %vm1128_vm2, %v5295_v50, 0.0 }
 0xe75   : > { %3632 = vadd.xlane.f32.xlu1 %v3631_v52 }
 0xe77   : > { %v5297_v54 = vpop.eup %5296 }
 0xe78   : > { %v3634_v58 = vsel %vm1128_vm2, %v5297_v54, 0.0 }
 0xe79   : > { %3635 = vadd.xlane.f32.xlu0 %v3634_v58 }
 0xef2   : > { %v3627_v59 = vpop.xlane.xlu1 %3626 }
 0xef3   : > { %5298 = vrcp.f32 %v3627_v59 }
 0xefa   : > { %v3630_v60 = vpop.xlane.xlu0 %3629 }
 0xefb   : > { %5300 = vrcp.f32 %v3630_v60 }
 0xefe   : > { %v3633_v23 = vpop.xlane.xlu1 %3632 }
 0xeff   : > { %5302 = vrcp.f32 %v3633_v23 }
 0xf00   : > { %v5299_v61 = vpop.eup %5298 }
 0xf01   : > { %v3641_v63 = vmul.f32 %v5299_v61, %v5291_v41 }
 0xf02   : > { %v3636_v0 = vpop.xlane.xlu0 %3635 }
 0xf03   : > { %5304 = vrcp.f32 %v3636_v0  ;;  %v3645_v2 = vpack.c.bf16 %v3641_v63, %v3641_v63  ;;  %v6367_v63 = vld [vmem:[%s6464_s9 + $0x8] sm:$0x7f] }
 0xf05   : > { %5095 = vmatmul.mubr.msk.bf16.vlgmr.msra.gmra.mxu1 %vm1128_vm2, %v3645_v2 }
 0xf06   : > { %5105 = vmatpush3.bf16.msra.mxu1 %v3749_v4  ;;  %5106 = vmatprep.mubr.msk.bf16.mxu1 %vm5377_vm0, %v5376_v1 }
 0xf07   : > { %5116 = vmatprep.subr.bf16.mxu1 %v5376_v1 }
 0xf08   : > { %v5301_v6 = vpop.eup %5300 }
 0xf09   : > { %v3642_v5 = vmul.f32 %v5301_v6, %v5293_v45 }
 0xf0b   : > { %v3646_v34 = vpack.c.bf16 %v3642_v5, %v3642_v5 }
 0xf0c   : > { %v5303_v7 = vpop.eup %5302 }
 0xf0d   : > { %5101 = vmatmul.mubr.msk.bf16.vlgmr.msra.gmra.mxu0 %vm1128_vm2, %v3646_v34  ;;  %v3643_v9 = vmul.f32 %v5303_v7, %v5295_v50  ;;  %v4040_v34 = vrot.slane %v6367_v63, %v2111_v19  ;;  %v5262_v19 = vld [vmem:[%s6459_s4 + $0x18] sm:$0xff]  }
 0xf0e   : > { %5111 = vmatpush3.bf16.msra.mxu0 %v3795_v8  ;;  %5112 = vmatprep.mubr.msk.bf16.mxu0 %vm5377_vm0, %v5376_v1 }
 0xf0f   : > { %v3647_v30 = vpack.c.bf16 %v3643_v9, %v3643_v9  ;;  %5122 = vmatprep.subr.bf16.mxu0 %v5376_v1 }
 0xf10   : > { %v5305_v32 = vpop.eup %5304 }
 0xf11   : > { %5107 = vmatmul.mubr.msk.bf16.vlgmr.msra.gmra.mxu1 %vm1128_vm2, %v3647_v30  ;;  %v3644_v12 = vmul.f32 %v5305_v32, %v5297_v54 }
 0xf12   : > { %5118 = vmatprep.mubr.msk.bf16.mxu1 %vm5377_vm0, %v5376_v1  ;;  %5117 = vmatpush3.bf16.msra.mxu1 %v3850_v13 }
 0xf13   : > { %v3648_v57 = vpack.c.bf16 %v3644_v12, %v3644_v12  ;;  %5128 = vmatprep.subr.bf16.mxu1 %v5376_v1 }
 0xf15   : > { %5113 = vmatmul.mubr.msk.bf16.vlgmr.msra.gmra.mxu0 %vm1128_vm2, %v3648_v57 }
 0xf16   : > { %5124 = vmatprep.mubr.msk.bf16.mxu0 %vm5377_vm0, %v5376_v1  ;;  %5123 = vmatpush3.bf16.msra.mxu0 %v3896_v15 }
 0xf17   : > { %5134 = vmatprep.subr.bf16.mxu0 %v5376_v1 }
 0xfc5   : > { %v3693_v17 = vpop.f32.mrf.mxu1 }
 0xfc6   : > { %v3837_v18 = vpack.c.bf16 %v3693_v17, %v3693_v17 }
 0xfc7   : > { %v5096_v20 = vpop.f32.mrf.mxu1 }
 0xfc8   : > { %5119 = vmatmul.mubr.msk.bf16.vlgmr.msra.gmra.mxu1 %vm1128_vm2, %v3837_v18 }
 0xfc9   : > { %v3696_v22 = vpop.f32.mrf.mxu1  ;;  %5129 = vmatpush3.bf16.msra.mxu1 %v3942_v46  ;;  %5130 = vmatprep.mubr.msk.bf16.mxu1 %vm5377_vm0, %v5376_v1  ;;  %v5263_v46 = vld [vmem:[%s6459_s4 + $0x10] sm:$0xff]  }
 0xfca   : > { %5140 = vmatprep.subr.bf16.mxu1 %v5376_v1 }
 0xfcb   : > { %v5097_v26 = vpop.f32.mrf.mxu1 }
 0xfcc   : > { %v4059_v26 = vrot.slane %v6367_v63, %v2131_v55  ;;  %v5265_v55 = vld [vmem:[%s6460_s5 + $0x30] sm:$0xff]  }
 0xfcd   : > { %v3739_v31 = vpop.f32.mrf.mxu0 }
 0xfce   : > { %v3838_v42 = vpack.c.bf16 %v3739_v31, %v3739_v31 }
 0xfcf   : > { %v5102_v35 = vpop.f32.mrf.mxu0 }
 0xfd0   : > { %5125 = vmatmul.mubr.msk.bf16.vlgmr.msra.gmra.mxu0 %vm1128_vm2, %v3838_v42  ;;  %v4064_v42 = vrot.slane %v6367_v63, %v2136_v56  ;;  %v5266_v56 = vld [vmem:[%s6460_s5 + $0x28] sm:$0xff]  }
 0xfd1   : > { %v3742_v36 = vpop.f32.mrf.mxu0  ;;  %v3785_v37 = vpop.f32.mrf.mxu1  ;;  %5135 = vmatpush3.bf16.msra.mxu0 %v3988_v33  ;;  %5136 = vmatprep.mubr.msk.bf16.mxu0 %vm5377_vm0, %v5376_v1 }
 0xfd2   : > { %v3839_v29 = vpack.c.bf16 %v3785_v37, %v3785_v37  ;;  %5148 = vmatprep.subr.bf16.mxu0 %v5376_v1  ;;  %v5264_v37 = vld [vmem:[%s6460_s5 + $0x38] sm:$0xff]  }
 0xfd3   : > { %v5103_v27 = vpop.f32.mrf.mxu0  ;;  %v5108_v38 = vpop.f32.mrf.mxu1 }
 0xfd4   : > { %5131 = vmatmul.mubr.msk.bf16.vlgmr.msra.gmra.mxu1 %vm1128_vm2, %v3839_v29  ;;  %v5267_v29 = vld [vmem:[%s6460_s5 + $0x20] sm:$0xff]   ;;  %v4075_v27 = vrot.slane %v6367_v63, %v2146_v3  ;;  %v4153_v3 = vrot.slane %v6367_v63, %v2223_v24 }
 0xfd5   : > { %v3788_v39 = vpop.f32.mrf.mxu1  ;;  %v3831_v51 = vpop.f32.mrf.mxu0  ;;  %5144 = vmatprep.mubr.msk.bf16.mxu1 %vm5377_vm0, %v5376_v1  ;;  %5141 = vmatpush3.bf16.msra.mxu1 %v5262_v19 }
 0xfd6   : > { %v3840_v53 = vpack.c.bf16 %v3831_v51, %v3831_v51  ;;  %5142 = vmatprep.subr.bf16.mxu1 %v5376_v1 }
 0xfd7   : > { %v5109_v40 = vpop.f32.mrf.mxu1  ;;  %v5114_v41 = vpop.f32.mrf.mxu0 }
 0xfd8   : > { %5137 = vmatmul.mubr.msk.bf16.vlgmr.msra.gmra.mxu0 %vm1128_vm2, %v3840_v53 }
 0xfd9   : > { %v3834_v43 = vpop.f32.mrf.mxu0  ;;  %5156 = vmatprep.mubr.msk.bf16.mxu0 %vm5377_vm0, %v5376_v1  ;;  %5143 = vmatpush3.bf16.msra.mxu1 %v5263_v46 }
 0xfda   : > { %5149 = vmatpush3.bf16.msra.mxu0 %v5264_v37 }
 0xfdb   : > { %v5115_v44 = vpop.f32.mrf.mxu0  ;;  %5150 = vmatprep.subr.bf16.mxu0 %v5376_v1 }
 0xfde   : > { %5151 = vmatpush3.bf16.msra.mxu0 %v5265_v55 }
 0xfdf   : > { %5152 = vmatprep.subr.bf16.mxu0 %v5376_v1 }
 0xfe2   : > { %5153 = vmatpush3.bf16.msra.mxu0 %v5266_v56 }
 0xfe3   : > { %5154 = vmatprep.subr.bf16.mxu0 %v5376_v1 }
 0xfe6   : > { %5155 = vmatpush3.bf16.msra.mxu0 %v5267_v29 }
0x1088   : > { %v3886_v45 = vpop.f32.mrf.mxu1 }
0x1089   : > { %v4030_v61 = vsel %vm402_vm1, %v3886_v45, 0.0 }
0x108a   : > { %v5120_v47 = vpop.f32.mrf.mxu1 }
0x108c   : > { %v3889_v50 = vpop.f32.mrf.mxu1 }
0x108e   : > { %v5121_v52 = vpop.f32.mrf.mxu1 }
0x1090   : > { %v3932_v54 = vpop.f32.mrf.mxu0 }
0x1091   : > { %v4031_v59 = vsel %vm402_vm1, %v3932_v54, 0.0 }
0x1092   : > { %v5126_v58 = vpop.f32.mrf.mxu0  ;;  %v4032_v0 = vadd.f32 %v4031_v59, %v4030_v61 }
0x1094   : > { %v3935_v60 = vpop.f32.mrf.mxu0  ;;  %v3978_v23 = vpop.f32.mrf.mxu1 }
0x1095   : > { %v4033_v21 = vsel %vm402_vm1, %v3978_v23, 0.0 }
0x1096   : > { %v5127_v2 = vpop.f32.mrf.mxu0  ;;  %v5132_v4 = vpop.f32.mrf.mxu1  ;;  %v4034_v6 = vadd.f32 %v4033_v21, %v4032_v0 }
0x1098   : > { %v3981_v62 = vpop.f32.mrf.mxu1  ;;  %v4024_v5 = vpop.f32.mrf.mxu0 }
0x1099   : > { %v4035_v7 = vsel %vm402_vm1, %v4024_v5, 0.0 }
0x109a   : > { %v4036_v8 = vadd.f32 %v4035_v7, %v4034_v6  ;;  %v5133_v9 = vpop.f32.mrf.mxu1  ;;  %v5138_v30 = vpop.f32.mrf.mxu0 }
0x109b   : > { %v4238_v9 = vrot.slane %v6367_v63, %v2309_v11 }
0x109c   : > { %v4041_v32 = vadd.f32 %v4040_v34, %v4036_v8  ;;  %v4027_v12 = vpop.f32.mrf.mxu0 }
0x109d   : > { %v4243_v12 = vrot.slane %v6367_v63, %v2314_v49 }
0x109e   : > { %v5139_v57 = vpop.f32.mrf.mxu0  ;;  %v4042_v10 = vadd.f32 %v4041_v32, %v5994_v25 }
0x10a0   : > { %v4043_v13 = vsel %vm402_vm1, %v4042_v10, 0.0 }
0x10a1   : > { %4044 = vadd.xlane.f32.xlu1 %v4043_v13 }
0x112a   : > { %v4045_v14 = vpop.xlane.xlu1 %4044 }
0x112b   : > { %v4046_v15 = vmul.f32 0.03125, %v4045_v14 }
0x112d   : > { %v4047_v16 = vsub.f32 %v4042_v10, %v4046_v15 }
0x112f   : > { %v4048_v17 = vmul.f32 %v4047_v16, %v4047_v16 }
0x1131   : > { %v4049_v18 = vsel %vm402_vm1, %v4048_v17, 0.0 }
0x1132   : > { %4050 = vadd.xlane.f32.xlu0 %v4049_v18 }
0x11bb   : > { %v4051_v25 = vpop.xlane.xlu0 %4050 }
0x11bc   : > { %v4052_v20 = vmul.f32 0.03125, %v4051_v25 }
0x11be   : > { %v4053_v22 = vadd.f32 1e-12, %v4052_v20 }
0x11c0   : > { %5306 = vrsqrt.f32 %v4053_v22 }
0x11cd   : > { %v5307_v28 = vpop.eup %5306 }
0x11ce   : > { %v4055_v31 = vmul.f32 %v5307_v28, %v4047_v16 }
0x11d0   : > { %v4060_v33 = vmul.f32 %v4059_v26, %v4055_v31 }
0x11d2   : > { %v4065_v35 = vadd.f32 %v4064_v42, %v4060_v33 }
0x11d4   : > { %v4066_v36 = vpack.c.bf16 %v4065_v35, %v4065_v35 }
0x11d6   : > { %5145 = vmatmul.mubr.msk.bf16.vlgmr.msra.gmra.mxu1 %vm402_vm1, %v4066_v36 }
0x1296   : > { %v4125_v38 = vpop.f32.mrf.mxu1 }
0x1297   : > { %v4126_v39 = vadd.f32 %v4125_v38, %v4075_v27 }
0x1298   : > { %v5146_v51 = vpop.f32.mrf.mxu1 }
0x1299   : > { %v4131_v53 = vmul.f32 %v4126_v39, %v4126_v39 }
0x129a   : > { %v4128_v40 = vpop.f32.mrf.mxu1 }
0x129b   : > { %v4132_v41 = vmul.f32 %v4131_v53, %v4126_v39 }
0x129c   : > { %v5147_v43 = vpop.f32.mrf.mxu1 }
0x129d   : > { %v4133_v44 = vmul.f32 0.044715, %v4132_v41 }
0x129f   : > { %v4134_v45 = vadd.f32 %v4133_v44, %v4126_v39 }
0x12a1   : > { %v4135_v47 = vmul.f32 0.7978846, %v4134_v45 }
0x12a3   : > { %5308 = vtanh.f32 %v4135_v47 }
0x12b0   : > { %v5309_v1 = vpop.eup %5308 }
0x12b1   : > { %v4137_v50 = vadd.f32 1.0, %v5309_v1 }
0x12b3   : > { %v4138_v52 = vmul.f32 0.5, %v4137_v50 }
0x12b5   : > { %v4139_v54 = vmul.f32 %v4138_v52, %v4126_v39 }
0x12b7   : > { %v4140_v58 = vpack.c.bf16 %v4139_v54, %v4139_v54 }
0x12b9   : > { %5157 = vmatmul.mubr.msk.bf16.vlgmr.msra.gmra.mxu0 %vm2249_vm12, %v4140_v58 }
0x1379   : > { %v4215_v59 = vpop.f32.mrf.mxu0 }
0x137a   : > { %v4216_v60 = vadd.f32 %v4215_v59, %v4153_v3 }
0x137b   : > { %v5158_v23 = vpop.f32.mrf.mxu0 }
0x137c   : > { %v4221_v61 = vadd.f32 %v4216_v60, %v4065_v35 }
0x137d   : > { %v4218_v21 = vpop.f32.mrf.mxu0 }
0x137e   : > { %v4222_v0 = vsel %vm402_vm1, %v4221_v61, 0.0 }
0x137f   : > { %4223 = vadd.xlane.f32.xlu1 %v4222_v0  ;;  %v5159_v2 = vpop.f32.mrf.mxu0 }
0x1408   : > { %v4224_v4 = vpop.xlane.xlu1 %4223 }
0x1409   : > { %v4225_v6 = vmul.f32 0.03125, %v4224_v4 }
0x140b   : > { %v4226_v62 = vsub.f32 %v4221_v61, %v4225_v6 }
0x140d   : > { %v4227_v5 = vmul.f32 %v4226_v62, %v4226_v62 }
0x140f   : > { %v4228_v34 = vsel %vm402_vm1, %v4227_v5, 0.0 }
0x1410   : > { %4229 = vadd.xlane.f32.xlu0 %v4228_v34 }
0x1499   : > { %v4230_v7 = vpop.xlane.xlu0 %4229 }
0x149a   : > { %v4231_v24 = vmul.f32 0.03125, %v4230_v7 }
0x149c   : > { %v4232_v8 = vadd.f32 1e-12, %v4231_v24 }
0x149e   : > { %5310 = vrsqrt.f32 %v4232_v8 }
0x14ab   : > { %v5311_v30 = vpop.eup %5310 }
0x14ac   : > { %v4234_v32 = vmul.f32 %v5311_v30, %v4226_v62 }
0x14ae   : > { %v4239_v57 = vmul.f32 %v4238_v9, %v4234_v32 }
0x14b0   : > { %v4244_v10 = vadd.f32 %v4243_v12, %v4239_v57 }
0x14b2   : > { %4245 = vst.msk [vmem:[%s361_s25] sm:$0xff] %vm402_vm1, %v4244_v10 }
0x14b3   : > { %5327 = shalt.err (!%p5324_p3)
}
0x14b4   : > { %s5328_s26 = scalar_lea.hbm %s4258_s30, 128  ;;  %s5332_s25 = scalar_lea.hbm %s6465_s10, 256 }
0x14b5   : > { %p5329_p4 = scmp.ne.s32.totalorder %s4258_s30, %s5328_s26  ;;  %p5333_p9 = scmp.lt.s32.totalorder %s4258_s30, %s6465_s10 }
0x14b6   : > { %p5334_p10 = scmp.lt.s32.totalorder %s5332_s25, %s5328_s26 }
0x14b7   : > { %p5330_p7 = pnand %p5329_p4, %p5479_p5 }
0x14b8   : > { %p5335_p11 = por %p5334_p10, %p5333_p9 }
0x14b9   : > { %p5331_p8 = pneg %p5330_p7 }
0x14bb   : > { %p5336_p12 = pnand %p5335_p11, %p5331_p8 }
0x14bd   : > { %5339 = shalt.err (!%p5336_p12)
}
0x14be   : > { %5160 = dma.vmem_to_hbm [thread:$0]  (%p5479_p5), %s4261_s18, 128, %s4258_s30, %s4247_s12  }
0x14bf PF: > { %p5166_p13 = scmp.ge.s32.totalorder %s5374_s16, 2  ;;  %s4272_s0 = sand.u32 1, %s5362_s13  }
0x14c0   : > { %s4273_s29 = scalar_lea.sflag [#allocation3], %s4272_s0 }
0x14c1   : > { %p5163_p0 = pnand %p5166_p13, %p5483_p6 }
0x14c3   : > { %p5164_p1 = pneg %p5163_p0 }
0x14c5   : > { %5357 = dma.done.wait (%p5164_p1), %s4273_s29, 128  }
0x14c6   : > { %5359 = vsyncadd (%p5164_p1), %s4273_s29, 4294967168  ;;  %p20_p2 = scmp.ge.s32.totalorder %s5466_s19, 4   ;;  %s6491_s13 = smov %s5366_s14 }
0x14c7   : > { %s6492_s14 = smov %s5370_s15  ;;  %s6493_s15 = smov %s5477_s22 }
0x14c8   : > { %s6494_s16 = smov %s5466_s19  ;;  %22 = sbr.rel (!%p20_p2) target bundleno = 5 (0x5), region = 110 }
0x14cd   :  { %4278 = vsyncpa [#allocation3], 1 }
0x14ce   :  { %4280 = vsyncpa [#allocation3 + $0x1], 1 }

</bundles_post_ra>
